<compile_context>
chip_gen: v6e
topology: v6e:2x2x1
jax: 0.10.0
libtpu: 0.0.40
codegen_flags: <defaults>
</compile_context>

<pallas_src>
import functools

import jax
import jax.numpy as jnp
from jax import lax
from jax.experimental import pallas as pl
from jax.experimental.pallas import tpu as pltpu


_FEAT = 2048      # inception_v3 penultimate feature width (fc = Identity)
_H1 = 128         # fc1 output width
_H2 = 64          # fc2 output width
_OUT_PAD = 128    # lane-dense padded fc3 width (true out_features sliced off in wrapper)

# Double-buffered x-tile budget: fits v7x (64 MiB physical VMEM) together with
# the resident weights; tiles this large are far past the per-step-overhead
# plateau, so no per-chip retuning is needed for v5e/v6e (128 MiB).
_X_TILE_BUDGET = 24 * 2**20


def _round_up(x, m):
    return (x + m - 1) // m * m


def _cdiv(a, b):
    return -(-a // b)


# ---------------------------------------------------------------------------
# Pallas kernel: streamed GAP accumulate + (stem + MLP head) at the last step
# ---------------------------------------------------------------------------
def _custominceptiont_kernel(x_ref,            # (TB, C, THW) input tile, original dtype
                             wp_ref, bp_ref,   # (C, 2048), (1, 2048)  stem (backbone surrogate)
                             w1_ref, b1_ref,   # (2048, 128), (1, 128) fc1
                             w2_ref, b2_ref,   # (128, 64),   (1, 64)  fc2
                             w3_ref, b3_ref,   # (64, 128),   (1, 128) fc3 (lane-padded)
                             o_ref,            # (TB, 128)
                             acc_ref,          # (TB, C) f32: running spatial sum
                             *, inv_hw, last_valid):
    j = pl.program_id(1)
    n_hw = pl.num_programs(1)
    thw = x_ref.shape[-1]

    @pl.when(j == 0)
    def _():
        acc_ref[...] = jnp.zeros_like(acc_ref)

    # --- streamed per-channel spatial-sum accumulation (f32 math, v5e-safe) --
    if last_valid == thw:
        # every spatial tile is full: plain lane-axis reduce
        acc_ref[...] += jnp.sum(x_ref[...].astype(jnp.float32), axis=-1)
    else:
        # ragged spatial tail: mask out-of-bounds lanes on the last step only
        @pl.when(j < n_hw - 1)
        def _():
            acc_ref[...] += jnp.sum(x_ref[...].astype(jnp.float32), axis=-1)

        @pl.when(j == n_hw - 1)
        def _():
            lane = lax.broadcasted_iota(jnp.int32, x_ref.shape, len(x_ref.shape) - 1)
            xm = jnp.where(lane < last_valid, x_ref[...].astype(jnp.float32), 0.0)
            acc_ref[...] += jnp.sum(xm, axis=-1)

    # --- stem + MLP head, once per batch tile on the last spatial step -------
    @pl.when(j == n_hw - 1)
    def _():
        # backbone surrogate: GAP (divide by the true H*W) + linear stem + ReLU
        pooled = acc_ref[...] * inv_hw                               # (TB, C)
        feat = jnp.dot(pooled, wp_ref[...],
                       preferred_element_type=jnp.float32) + bp_ref[...]
        feat = jnp.maximum(feat, 0.0)                                # == base_model(x).view(B, -1)

        # x = relu(fc1(x)); dropout(0.4) == identity in eval mode
        h1 = jnp.maximum(jnp.dot(feat, w1_ref[...],
                                 preferred_element_type=jnp.float32) + b1_ref[...], 0.0)
        # x = relu(fc2(x)); dropout2(0.2) == identity in eval mode
        h2 = jnp.maximum(jnp.dot(h1, w2_ref[...],
                                 preferred_element_type=jnp.float32) + b2_ref[...], 0.0)
        # x = fc3(x)   (lane-padded to 128 outputs -> unmasked store)
        o_ref[...] = jnp.dot(h2, w3_ref[...],
                             preferred_element_type=jnp.float32) + b3_ref[...]


# ---------------------------------------------------------------------------
# Parameter setup (deterministic synthetic, shapes follow the module __init__)
# ---------------------------------------------------------------------------
def init_params(key, in_channels=3, out_features=2):
    ks = jax.random.split(key, 8)

    def lin(kw, kb, fan_in, fan_out):
        bound = 1.0 / jnp.sqrt(jnp.float32(fan_in))
        w = jax.random.uniform(kw, (fan_in, fan_out), jnp.float32, -bound, bound)
        b = jax.random.uniform(kb, (1, fan_out), jnp.float32, -bound, bound)
        return w, b

    wp, bp = lin(ks[0], ks[1], in_channels, _FEAT)   # backbone-surrogate stem C -> 2048
    w1, b1 = lin(ks[2], ks[3], _FEAT, _H1)           # fc1: Linear(2048, 128)
    w2, b2 = lin(ks[4], ks[5], _H1, _H2)             # fc2: Linear(128, 64)
    w3, b3 = lin(ks[6], ks[7], _H2, out_features)    # fc3: Linear(64, 2)
    return dict(wp=wp, bp=bp, w1=w1, b1=b1, w2=w2, b2=b2, w3=w3, b3=b3)


# ---------------------------------------------------------------------------
# Wrapper: layout plumbing + pallas_call
# ---------------------------------------------------------------------------
def custominceptiont_forward(x_nchw, params, *, out_features=2, max_tile_hw=None):
    """Eval-mode forward of Custominceptiont.  x_nchw: (B, C, H, W)."""
    B, C, H, W = x_nchw.shape
    HW = H * W
    # The torch forward only *prints* a resize warning for H/W < 75; it does
    # not resize, so no spatial transform is applied here either.

    # Free view for contiguous NCHW: no cast, no pad, no extra HBM copy.
    x = x_nchw.reshape(B, C, HW)

    # --- batch tiling: 8-row tiles (or the whole batch if it is small) -------
    TB = B if B <= 8 else 8
    nb = _cdiv(B, TB)
    B_out = nb * TB                 # only the freshly-allocated output is padded

    # --- spatial tiling: balanced lane tiles, sized by real VMEM footprint ---
    itemsize = x.dtype.itemsize
    sublane = max(8, 32 // itemsize)                    # f32 -> 8, bf16 -> 16, int8 -> 32
    c_pad = _round_up(C, sublane)                       # VMEM sublane padding of the x tile
    budget_hw = max(128, (_X_TILE_BUDGET // (2 * TB * c_pad * itemsize)) // 128 * 128)
    tile_cap = budget_hw if max_tile_hw is None else max(128, min(max_tile_hw, budget_hw))

    if HW <= 128:
        THW = HW                                        # single full-extent tile (lane exemption)
    else:
        n = _cdiv(HW, tile_cap)
        THW = min(_round_up(_cdiv(HW, n), 128), (HW // 128) * 128)
    n_hw = _cdiv(HW, THW)
    last_valid = HW - (n_hw - 1) * THW                  # valid lanes in the last spatial tile

    # Lane-pad fc3 to 128 outputs (zero columns) so the final store is unmasked.
    w3 = jnp.zeros((_H2, _OUT_PAD), jnp.float32).at[:, :out_features].set(params["w3"])
    b3 = jnp.zeros((1, _OUT_PAD), jnp.float32).at[:, :out_features].set(params["b3"])

    grid = (nb, n_hw)

    def const_spec(shape):
        # Constant index_map -> block stays resident, fetched once, never re-DMA'd.
        return pl.BlockSpec(shape, lambda i, j: (0,) * len(shape))

    # Real VMEM footprint: correct dtype sublane tiling + actual buffer counts.
    x_bytes = 2 * TB * c_pad * THW * itemsize                       # double-buffered x stream
    w_elems = (C * _FEAT + _FEAT + _FEAT * _H1 + _H1
               + _H1 * _H2 + _H2 + _H2 * _OUT_PAD + _OUT_PAD)
    w_bytes = 2 * 4 * w_elems                                       # resident f32 weights
    o_bytes = 2 * TB * _OUT_PAD * 4
    s_bytes = _round_up(TB, 8) * _round_up(C, 128) * 4              # acc scratch (padded)
    vmem_limit = int(max(x_bytes + w_bytes + o_bytes + s_bytes + (4 << 20), 16 << 20))

    out = pl.pallas_call(
        functools.partial(_custominceptiont_kernel,
                          inv_hw=1.0 / float(HW), last_valid=int(last_valid)),
        out_shape=jax.ShapeDtypeStruct((B_out, _OUT_PAD), jnp.float32),
        grid=grid,
        in_specs=[
            pl.BlockSpec((TB, C, THW), lambda i, j: (i, 0, j)),
            const_spec(params["wp"].shape), const_spec(params["bp"].shape),
            const_spec(params["w1"].shape), const_spec(params["b1"].shape),
            const_spec(params["w2"].shape), const_spec(params["b2"].shape),
            const_spec(w3.shape), const_spec(b3.shape),
        ],
        out_specs=pl.BlockSpec((TB, _OUT_PAD), lambda i, j: (i, 0)),
        scratch_shapes=[pltpu.VMEM((TB, C), jnp.float32)],
        compiler_params=pltpu.CompilerParams(
            dimension_semantics=("parallel", "arbitrary"),
            vmem_limit_bytes=vmem_limit),
    )(x, params["wp"], params["bp"],
      params["w1"], params["b1"],
      params["w2"], params["b2"],
      w3, b3)

    return out[:B, :out_features]


# ---------------------------------------------------------------------------
# Pure-JAX reference (same math) for a sanity check
# ---------------------------------------------------------------------------
def _reference(x_nchw, params):
    B, C, H, W = x_nchw.shape
    pooled = jnp.mean(x_nchw.astype(jnp.float32).reshape(B, C, H * W), axis=-1)
    hp = jax.lax.Precision.HIGHEST
    feat = jnp.maximum(jnp.dot(pooled, params["wp"], precision=hp) + params["bp"], 0.0)
    h1 = jnp.maximum(jnp.dot(feat, params["w1"], precision=hp) + params["b1"], 0.0)
    h2 = jnp.maximum(jnp.dot(h1, params["w2"], precision=hp) + params["b2"], 0.0)
    return jnp.dot(h2, params["w3"], precision=hp) + params["b3"]


if __name__ == "__main__":
    key = jax.random.PRNGKey(0)
    k_x, k_p, k_x2 = jax.random.split(key, 3)

    # small NCHW input consistent with the module's image input
    x = jax.random.normal(k_x, (2, 4, 16, 16), jnp.float32)
    params = init_params(k_p, in_channels=4, out_features=2)

    out = jax.block_until_ready(custominceptiont_forward(x, params))
    ref = _reference(x, params)
    assert out.shape == (2, 2)
    assert bool(jnp.allclose(out, ref, atol=2e-2, rtol=2e-2)), "single-tile path mismatch"

    # multi spatial-step accumulation path (grid = (1, 2))
    out_tiled = jax.block_until_ready(
        custominceptiont_forward(x, params, max_tile_hw=128))
    assert bool(jnp.allclose(out_tiled, ref, atol=2e-2, rtol=2e-2)), "tiled path mismatch"

    # ragged batch tiles (B=10, TB=8) + masked non-multiple-of-128 spatial tail (HW=169)
    x2 = jax.random.normal(k_x2, (10, 3, 13, 13), jnp.float32)
    params2 = init_params(k_p, in_channels=3, out_features=2)
    out2 = jax.block_until_ready(custominceptiont_forward(x2, params2))
    ref2 = _reference(x2, params2)
    assert out2.shape == (10, 2)
    assert bool(jnp.allclose(out2, ref2, atol=2e-2, rtol=2e-2)), "ragged path mismatch"

    print("KERNEL_OK")
</pallas_src>

<mosaic_0001>
module attributes {stable_mosaic.version = 11 : i64} {
  func.func @_custominceptiont_kernel(%arg0: i32, %arg1: i32, %arg2: memref<2x4x256xf32, #tpu.memory_space<vmem>>, %arg3: memref<4x2048xf32, #tpu.memory_space<vmem>>, %arg4: memref<1x2048xf32, #tpu.memory_space<vmem>>, %arg5: memref<2048x128xf32, #tpu.memory_space<vmem>>, %arg6: memref<1x128xf32, #tpu.memory_space<vmem>>, %arg7: memref<128x64xf32, #tpu.memory_space<vmem>>, %arg8: memref<1x64xf32, #tpu.memory_space<vmem>>, %arg9: memref<64x128xf32, #tpu.memory_space<vmem>>, %arg10: memref<1x128xf32, #tpu.memory_space<vmem>>, %arg11: memref<2x128xf32, #tpu.memory_space<vmem>>, %arg12: memref<2x4xf32, #tpu.memory_space<vmem>>) attributes {dimension_semantics = [#tpu.dimension_semantics<parallel>, #tpu.dimension_semantics<arbitrary>], iteration_bounds = array<i64: 1, 1>, scalar_prefetch = 0 : i64, scratch_operands = 1 : i64, tpu.core_type = #tpu.core_type<tc>, window_params = [{transform_indices = @transform_0, window_bounds = array<i64: 2, 4, 256>}, {pipeline_mode = #tpu.pipeline_mode<synchronous>, transform_indices = @transform_1, window_bounds = array<i64: 4, 2048>}, {pipeline_mode = #tpu.pipeline_mode<synchronous>, transform_indices = @transform_2, window_bounds = array<i64: 1, 2048>}, {pipeline_mode = #tpu.pipeline_mode<synchronous>, transform_indices = @transform_3, window_bounds = array<i64: 2048, 128>}, {pipeline_mode = #tpu.pipeline_mode<synchronous>, transform_indices = @transform_4, window_bounds = array<i64: 1, 128>}, {pipeline_mode = #tpu.pipeline_mode<synchronous>, transform_indices = @transform_5, window_bounds = array<i64: 128, 64>}, {pipeline_mode = #tpu.pipeline_mode<synchronous>, transform_indices = @transform_6, window_bounds = array<i64: 1, 64>}, {pipeline_mode = #tpu.pipeline_mode<synchronous>, transform_indices = @transform_7, window_bounds = array<i64: 64, 128>}, {pipeline_mode = #tpu.pipeline_mode<synchronous>, transform_indices = @transform_8, window_bounds = array<i64: 1, 128>}, {transform_indices = @transform_9, window_bounds = array<i64: 2, 128>}]} {
    %c0_i32 = arith.constant 0 : i32
    %0 = arith.cmpi eq, %arg1, %c0_i32 : i32
    %1 = arith.extui %0 : i1 to i32
    %c0_i32_0 = arith.constant 0 : i32
    %2 = arith.cmpi ne, %1, %c0_i32_0 : i32
    scf.if %2 {
      %cst_9 = arith.constant 0.000000e+00 : f32
      %11 = vector.broadcast %cst_9 : f32 to vector<2x4xf32>
      %c0_10 = arith.constant 0 : index
      %c0_11 = arith.constant 0 : index
      %12 = vector.load %arg12[%c0_10, %c0_11] : memref<2x4xf32, #tpu.memory_space<vmem>>, vector<2x4xf32>
      tpu.vector_store %arg12[%c0_10, %c0_11], %11 {strides = array<i32>} : memref<2x4xf32, #tpu.memory_space<vmem>>, vector<2x4xf32>,
    } else {
    }
    %c0 = arith.constant 0 : index
    %c0_1 = arith.constant 0 : index
    %3 = vector.load %arg12[%c0, %c0_1] : memref<2x4xf32, #tpu.memory_space<vmem>>, vector<2x4xf32>
    %c0_2 = arith.constant 0 : index
    %c0_3 = arith.constant 0 : index
    %c0_4 = arith.constant 0 : index
    %4 = vector.load %arg2[%c0_2, %c0_3, %c0_4] : memref<2x4x256xf32, #tpu.memory_space<vmem>>, vector<2x4x256xf32>
    %cst = arith.constant dense<0.000000e+00> : vector<2x4xf32>
    %5 = vector.multi_reduction <add>, %4, %cst [2] : vector<2x4x256xf32> to vector<2x4xf32>
    %6 = arith.addf %3, %5 : vector<2x4xf32>
    %c0_5 = arith.constant 0 : index
    %c0_6 = arith.constant 0 : index
    %7 = vector.load %arg12[%c0_5, %c0_6] : memref<2x4xf32, #tpu.memory_space<vmem>>, vector<2x4xf32>
    tpu.vector_store %arg12[%c0_5, %c0_6], %6 {strides = array<i32>} : memref<2x4xf32, #tpu.memory_space<vmem>>, vector<2x4xf32>,
    %c0_i32_7 = arith.constant 0 : i32
    %8 = arith.cmpi eq, %arg1, %c0_i32_7 : i32
    %9 = arith.extui %8 : i1 to i32
    %c0_i32_8 = arith.constant 0 : i32
    %10 = arith.cmpi ne, %9, %c0_i32_8 : i32
    scf.if %10 {
      %c0_9 = arith.constant 0 : index
      %c0_10 = arith.constant 0 : index
      %11 = vector.load %arg12[%c0_9, %c0_10] : memref<2x4xf32, #tpu.memory_space<vmem>>, vector<2x4xf32>
      %cst_11 = arith.constant 3.906250e-03 : f32
      %12 = vector.broadcast %cst_11 : f32 to vector<2x4xf32>
      %13 = arith.mulf %11, %12 : vector<2x4xf32>
      %c0_12 = arith.constant 0 : index
      %c0_13 = arith.constant 0 : index
      %14 = vector.load %arg3[%c0_12, %c0_13] : memref<4x2048xf32, #tpu.memory_space<vmem>>, vector<4x2048xf32>
      %cst_14 = arith.constant dense<0.000000e+00> : vector<2x2048xf32>
      %15 = tpu.matmul %13, %14, %cst_14 {dimension_numbers = #tpu.dot_dimension_numbers<[1], [0], [0], [1], [0, 0, 1, 1], [], []>} : vector<2x4xf32>, vector<4x2048xf32>, vector<2x2048xf32> -> vector<2x2048xf32>
      %c0_15 = arith.constant 0 : index
      %c0_16 = arith.constant 0 : index
      %16 = vector.load %arg4[%c0_15, %c0_16] : memref<1x2048xf32, #tpu.memory_space<vmem>>, vector<1x2048xf32>
      %17 = vector.broadcast %16 : vector<1x2048xf32> to vector<2x2048xf32>
      %18 = arith.addf %15, %17 : vector<2x2048xf32>
      %cst_17 = arith.constant 0.000000e+00 : f32
      %19 = vector.broadcast %cst_17 : f32 to vector<2x2048xf32>
      %20 = arith.maximumf %18, %19 : vector<2x2048xf32>
      %c0_18 = arith.constant 0 : index
      %c0_19 = arith.constant 0 : index
      %21 = vector.load %arg5[%c0_18, %c0_19] : memref<2048x128xf32, #tpu.memory_space<vmem>>, vector<2048x128xf32>
      %cst_20 = arith.constant dense<0.000000e+00> : vector<2x128xf32>
      %22 = tpu.matmul %20, %21, %cst_20 {dimension_numbers = #tpu.dot_dimension_numbers<[1], [0], [0], [1], [0, 0, 1, 1], [], []>} : vector<2x2048xf32>, vector<2048x128xf32>, vector<2x128xf32> -> vector<2x128xf32>
      %c0_21 = arith.constant 0 : index
      %c0_22 = arith.constant 0 : index
      %23 = vector.load %arg6[%c0_21, %c0_22] : memref<1x128xf32, #tpu.memory_space<vmem>>, vector<1x128xf32>
      %24 = vector.broadcast %23 : vector<1x128xf32> to vector<2x128xf32>
      %25 = arith.addf %22, %24 : vector<2x128xf32>
      %cst_23 = arith.constant 0.000000e+00 : f32
      %26 = vector.broadcast %cst_23 : f32 to vector<2x128xf32>
      %27 = arith.maximumf %25, %26 : vector<2x128xf32>
      %c0_24 = arith.constant 0 : index
      %c0_25 = arith.constant 0 : index
      %28 = vector.load %arg7[%c0_24, %c0_25] : memref<128x64xf32, #tpu.memory_space<vmem>>, vector<128x64xf32>
      %cst_26 = arith.constant dense<0.000000e+00> : vector<2x64xf32>
      %29 = tpu.matmul %27, %28, %cst_26 {dimension_numbers = #tpu.dot_dimension_numbers<[1], [0], [0], [1], [0, 0, 1, 1], [], []>} : vector<2x128xf32>, vector<128x64xf32>, vector<2x64xf32> -> vector<2x64xf32>
      %c0_27 = arith.constant 0 : index
      %c0_28 = arith.constant 0 : index
      %30 = vector.load %arg8[%c0_27, %c0_28] : memref<1x64xf32, #tpu.memory_space<vmem>>, vector<1x64xf32>
      %31 = vector.broadcast %30 : vector<1x64xf32> to vector<2x64xf32>
      %32 = arith.addf %29, %31 : vector<2x64xf32>
      %cst_29 = arith.constant 0.000000e+00 : f32
      %33 = vector.broadcast %cst_29 : f32 to vector<2x64xf32>
      %34 = arith.maximumf %32, %33 : vector<2x64xf32>
      %c0_30 = arith.constant 0 : index
      %c0_31 = arith.constant 0 : index
      %35 = vector.load %arg9[%c0_30, %c0_31] : memref<64x128xf32, #tpu.memory_space<vmem>>, vector<64x128xf32>
      %cst_32 = arith.constant dense<0.000000e+00> : vector<2x128xf32>
      %36 = tpu.matmul %34, %35, %cst_32 {dimension_numbers = #tpu.dot_dimension_numbers<[1], [0], [0], [1], [0, 0, 1, 1], [], []>} : vector<2x64xf32>, vector<64x128xf32>, vector<2x128xf32> -> vector<2x128xf32>
      %c0_33 = arith.constant 0 : index
      %c0_34 = arith.constant 0 : index
      %37 = vector.load %arg10[%c0_33, %c0_34] : memref<1x128xf32, #tpu.memory_space<vmem>>, vector<1x128xf32>
      %38 = vector.broadcast %37 : vector<1x128xf32> to vector<2x128xf32>
      %39 = arith.addf %36, %38 : vector<2x128xf32>
      %c0_35 = arith.constant 0 : index
      %c0_36 = arith.constant 0 : index
      %40 = vector.load %arg11[%c0_35, %c0_36] : memref<2x128xf32, #tpu.memory_space<vmem>>, vector<2x128xf32>
      tpu.vector_store %arg11[%c0_35, %c0_36], %39 {strides = array<i32>} : memref<2x128xf32, #tpu.memory_space<vmem>>, vector<2x128xf32>,
    } else {
    }
    return
  }
  func.func @transform_0(%arg0: i32, %arg1: i32) -> (i32, i32, i32) {
    %c0_i32 = arith.constant 0 : i32
    %c0_i32_0 = arith.constant 0 : i32
    return %arg0, %c0_i32, %arg1 : i32, i32, i32
  }
  func.func @transform_1(%arg0: i32, %arg1: i32) -> (i32, i32) {
    %c0_i32 = arith.constant 0 : i32
    %c0_i32_0 = arith.constant 0 : i32
    %c0_i32_1 = arith.constant 0 : i32
    return %c0_i32, %c0_i32_0 : i32, i32
  }
  func.func @transform_2(%arg0: i32, %arg1: i32) -> (i32, i32) {
    %c0_i32 = arith.constant 0 : i32
    %c0_i32_0 = arith.constant 0 : i32
    %c0_i32_1 = arith.constant 0 : i32
    return %c0_i32, %c0_i32_0 : i32, i32
  }
  func.func @transform_3(%arg0: i32, %arg1: i32) -> (i32, i32) {
    %c0_i32 = arith.constant 0 : i32
    %c0_i32_0 = arith.constant 0 : i32
    %c0_i32_1 = arith.constant 0 : i32
    return %c0_i32, %c0_i32_0 : i32, i32
  }
  func.func @transform_4(%arg0: i32, %arg1: i32) -> (i32, i32) {
    %c0_i32 = arith.constant 0 : i32
    %c0_i32_0 = arith.constant 0 : i32
    %c0_i32_1 = arith.constant 0 : i32
    return %c0_i32, %c0_i32_0 : i32, i32
  }
  func.func @transform_5(%arg0: i32, %arg1: i32) -> (i32, i32) {
    %c0_i32 = arith.constant 0 : i32
    %c0_i32_0 = arith.constant 0 : i32
    %c0_i32_1 = arith.constant 0 : i32
    return %c0_i32, %c0_i32_0 : i32, i32
  }
  func.func @transform_6(%arg0: i32, %arg1: i32) -> (i32, i32) {
    %c0_i32 = arith.constant 0 : i32
    %c0_i32_0 = arith.constant 0 : i32
    %c0_i32_1 = arith.constant 0 : i32
    return %c0_i32, %c0_i32_0 : i32, i32
  }
  func.func @transform_7(%arg0: i32, %arg1: i32) -> (i32, i32) {
    %c0_i32 = arith.constant 0 : i32
    %c0_i32_0 = arith.constant 0 : i32
    %c0_i32_1 = arith.constant 0 : i32
    return %c0_i32, %c0_i32_0 : i32, i32
  }
  func.func @transform_8(%arg0: i32, %arg1: i32) -> (i32, i32) {
    %c0_i32 = arith.constant 0 : i32
    %c0_i32_0 = arith.constant 0 : i32
    %c0_i32_1 = arith.constant 0 : i32
    return %c0_i32, %c0_i32_0 : i32, i32
  }
  func.func @transform_9(%arg0: i32, %arg1: i32) -> (i32, i32) {
    %c0_i32 = arith.constant 0 : i32
    %c0_i32_0 = arith.constant 0 : i32
    return %arg0, %c0_i32 : i32, i32
  }
}

</mosaic_0001>

<bundles_post_ra>
// kernel: tpu_custom_call.1
= control target key start
LH: loop header
LB: loop body
LE: loop exit
PB: predicated region body
PF: predicated region fallthrough
CT: control target
= control target key end

     0   :  { %14 = vsyncpa [#allocation4], 0  ;;  %s2626_s0 = inlined_call_operand.vmem [shape: f32[2,4,256], index: 0, kind: input, shape index: {}]   ;;  %s2627_s1 = inlined_call_operand.vmem [shape: f32[4,2048], index: 1, kind: input, shape index: {}]   ;;  %s2628_s2 = inlined_call_operand.vmem [shape: f32[1,2048], index: 2, kind: input, shape index: {}]   ;;  %s2629_s3 = inlined_call_operand.hbm [shape: f32[2048,128], index: 3, kind: input, shape index: {}]   ;;  %s2630_s4 = inlined_call_operand.vmem [shape: f32[1,128], index: 4, kind: input, shape index: {}]   ;;  %s2631_s5 = inlined_call_operand.vmem [shape: f32[128,64], index: 5, kind: input, shape index: {}]   ;;  %s2632_s6 = inlined_call_operand.vmem [shape: f32[1,64], index: 6, kind: input, shape index: {}]   ;;  %s2633_s7 = inlined_call_operand.vmem [shape: f32[64,128], index: 7, kind: input, shape index: {}]   ;;  %s2634_s8 = inlined_call_operand.vmem [shape: f32[1,128], index: 8, kind: input, shape index: {}]   ;;  %s2635_s9 = inlined_call_operand.hbm [shape: f32[2,128], index: 9, kind: output, shape index: {}]  }
   0x1   :  { %15 = vsyncpa [#allocation5], 0  ;;  %s2295_s30 = smov [#allocation3]  }
   0x2   :  { %s27_s10 = sshll.u32 %s2295_s30, 4  ;;  %s28_s10 = int_to_ptr.vmem [resolvable:$true] %s27_s10 }
   0x3   :  { %s2259_s11 = scalar_lea.vmem %s28_s10, 32768  ;;  %p2264_p1 = scmp.lt.s32.totalorder %s28_s10, %s28_s10 }
   0x4   :  { %p2260_p0 = scmp.ne.s32.totalorder %s28_s10, %s2259_s11  ;;  %p2265_p2 = scmp.lt.s32.totalorder %s2259_s11, %s2259_s11 }
   0x6   :  { %p2266_p3 = por %p2265_p2, %p2264_p1 }
   0x8   :  { %p2267_p4 = pnand %p2266_p3, %p2260_p0 }
   0xa   :  { %2270 = shalt.err (!%p2267_p4)
}
   0xb   :  { %s2296_s12 = smov 128   ;;  %s2297_s13 = smov 8  }
   0xc   :  { %33 = dma.hbm_to_vmem [thread:$0]  %s2629_s3, 32768, %s28_s10, [#allocation4], %s2296_s12, %s2296_s12, %s2297_s13  }
   0xd   :  { %2291 = dma.done.wait [#allocation4], 32768  }
   0xe   :  { %2292 = vsyncadd [#allocation4], 4294934528  ;;  %vm62_vm0 = vcmask 1043456   ;;  %v54_v0 = vld [vmem:[%s2626_s0] sm:$0xff]  ;;  %v55_v1 = vld [vmem:[%s2626_s0 + $0x8] sm:$0xff]  ;;  %vm51_vm1 = vcmask 25600   ;;  %v75_v19 = vlaneseq }
   0xf   :  { %v58_v2 = vcombine.high %v54_v0, %v54_v0  ;;  %v63_v3 = vsel %vm62_vm0, %v54_v0, 0.0  ;;  %v59_v4 = vcombine.high %v55_v1, %v55_v1  ;;  %v68_v6 = vsel %vm62_vm0, %v55_v1, 0.0  ;;  %v96_v11 = vld [vmem:[%s2627_s1] sm:$0xff]  ;;  %v97_v13 = vld [vmem:[%s2627_s1 + $0x8] sm:$0xff]  ;;  %v102_v17 = vld [vmem:[%s2627_s1 + $0x30] sm:$0xff]  ;;  %s2300_s17 = smov [#allocation6]  }
  0x10   :  { %v2298_v10 = vmov 0.0   ;;  %v100_v12 = vld [vmem:[%s2627_s1 + $0x20] sm:$0xff]  ;;  %v196_v14 = vcombine.high %v96_v11, %v96_v11  ;;  %v197_v16 = vcombine.high %v97_v13, %v97_v13  ;;  %v202_v18 = vcombine.high %v102_v17, %v102_v17  ;;  %v98_v30 = vld [vmem:[%s2627_s1 + $0x10] sm:$0xff]  ;;  %v99_v34 = vld [vmem:[%s2627_s1 + $0x18] sm:$0xff]  ;;  %s1838_s18 = sshll.u32 %s2300_s17, 4  ;;  %s1839_s18 = int_to_ptr.vmem [resolvable:$true] %s1838_s18 }
  0x11   :  { %v64_v5 = vsel %vm62_vm0, %v58_v2, 0.0  ;;  %v69_v7 = vsel %vm62_vm0, %v59_v4, 0.0  ;;  %52 = vst.msk [vmem:[#allocation2] sm:$0x3] %vm51_vm1, %v2298_v10  ;;  %304 = vmatprep.mubr.f32.mxu1 %v2298_v10  ;;  %588 = vmatprep.mubr.f32.mxu0 %v2298_v10  ;;  %v200_v15 = vcombine.high %v100_v12, %v100_v12  ;;  %v76_v20 = vand.u32 127, %v75_v19  ;;  %v855_v35 = vld [vmem:[#allocation3 + $0xf8] sm:$0xff]  ;;  %p2276_p6 = scmp.lt.s32.totalorder %s1839_s18, %s1839_s18 }
  0x12   :  { %v65_v8 = vadd.f32 %v64_v5, %v63_v3  ;;  %v70_v9 = vadd.f32 %v69_v7, %v68_v6  ;;  %1847 = vmatprep.subr.msk.mxu1 %vm62_vm0, %v196_v14  ;;  %v2386_v21 = vshrl.u32 %v75_v19, 7  ;;  %vm85_vm2 = vcmask 1041409   ;;  %v101_v37 = vld [vmem:[%s2627_s1 + $0x28] sm:$0xff]  ;;  %v839_v38 = vld [vmem:[#allocation3 + $0x78] sm:$0xff]  ;;  %v854_v39 = vld [vmem:[#allocation3 + $0xf0] sm:$0xff] }
  0x13   :  { %1859 = vmatprep.subr.msk.mxu0 %vm62_vm0, %v200_v15  ;;  %1848 = vmatpush1.msk.msra.mxu1 %vm62_vm0, %v96_v11  ;;  %vm204_vm3 = vcmask 31744   ;;  %v198_v33 = vcombine.high %v98_v30, %v98_v30  ;;  %v199_v36 = vcombine.high %v99_v34, %v99_v34  ;;  %v838_v40 = vld [vmem:[#allocation3 + $0x70] sm:$0xff]  ;;  %v201_v41 = vcombine.high %v101_v37, %v101_v37  ;;  %v853_v43 = vld [vmem:[#allocation3 + $0xe8] sm:$0xff]  ;;  %v852_v45 = vld [vmem:[#allocation3 + $0xe0] sm:$0xff] }
  0x14   :  { %66 = vadd.xlane.f32.xlu0 %v65_v8  ;;  %1860 = vmatpush1.msk.msra.mxu0 %vm62_vm0, %v100_v12  ;;  %v79_v23 = vsub.s32 %v76_v20, %v2386_v21  ;;  %v103_v42 = vld [vmem:[%s2627_s1 + $0x38] sm:$0xff]  ;;  %v837_v44 = vld [vmem:[#allocation3 + $0x68] sm:$0xff]  ;;  %v836_v47 = vld [vmem:[#allocation3 + $0x60] sm:$0xff]  ;;  %vm2299_vm4 = vmmov 0   ;;  %vm1757_vm5 = vcmask 523264  }
  0x15   :  { %1850 = vmatprep.subr.msk.mxu1 %vm62_vm0, %v197_v16  ;;  %1865 = vmatprep.subr.msk.mxu0 %vm62_vm0, %v202_v18  ;;  %v203_v46 = vcombine.high %v103_v42, %v103_v42  ;;  %v851_v48 = vld [vmem:[#allocation3 + $0xd8] sm:$0xff]  ;;  %v850_v51 = vld [vmem:[#allocation3 + $0xd0] sm:$0xff]  ;;  %v849_v53 = vld [vmem:[#allocation3 + $0xc8] sm:$0xff] }
  0x16   :  { %v835_v49 = vld [vmem:[#allocation3 + $0x58] sm:$0xff]  ;;  %v834_v52 = vld [vmem:[#allocation3 + $0x50] sm:$0xff]  ;;  %v833_v55 = vld [vmem:[#allocation3 + $0x48] sm:$0xff] }
  0x17   :  { %v887_v50 = vld [vmem:[#allocation3 + $0x1f8] sm:$0xff]  ;;  %v886_v56 = vld [vmem:[#allocation3 + $0x1f0] sm:$0xff]  ;;  %v848_v57 = vld [vmem:[#allocation3 + $0xc0] sm:$0xff] }
  0x18   :  { %71 = vadd.xlane.f32.xlu0 %v70_v9  ;;  %v53_v26 = vld [vmem:[#allocation2] sm:$0x3]  ;;  %v870_v58 = vld [vmem:[#allocation3 + $0x170] sm:$0xff]  ;;  %v832_v59 = vld [vmem:[#allocation3 + $0x40] sm:$0xff] }
  0x19   :  { %v871_v54 = vld [vmem:[#allocation3 + $0x178] sm:$0xff]  ;;  %v885_v60 = vld [vmem:[#allocation3 + $0x1e8] sm:$0xff]  ;;  %v884_v0 = vld [vmem:[#allocation3 + $0x1e0] sm:$0xff] }
  0x1a   :  { %v847_v61 = vld [vmem:[#allocation3 + $0xb8] sm:$0xff]  ;;  %v869_v62 = vld [vmem:[#allocation3 + $0x168] sm:$0xff]  ;;  %v846_v1 = vld [vmem:[#allocation3 + $0xb0] sm:$0xff] }
  0x1b   :  { %v831_v63 = vld [vmem:[#allocation3 + $0x38] sm:$0xff]  ;;  %v868_v2 = vld [vmem:[#allocation3 + $0x160] sm:$0xff]  ;;  %v830_v3 = vld [vmem:[#allocation3 + $0x30] sm:$0xff] }
  0x1c   :  { %v883_v4 = vld [vmem:[#allocation3 + $0x1d8] sm:$0xff]  ;;  %v845_v5 = vld [vmem:[#allocation3 + $0xa8] sm:$0xff]  ;;  %v882_v8 = vld [vmem:[#allocation3 + $0x1d0] sm:$0xff] }
  0x1d   :  { %v867_v6 = vld [vmem:[#allocation3 + $0x158] sm:$0xff]  ;;  %v829_v7 = vld [vmem:[#allocation3 + $0x28] sm:$0xff]  ;;  %v844_v9 = vld [vmem:[#allocation3 + $0xa0] sm:$0xff] }
  0x1e   :  { %v866_v11 = vld [vmem:[#allocation3 + $0x150] sm:$0xff]  ;;  %v828_v12 = vld [vmem:[#allocation3 + $0x20] sm:$0xff]  ;;  %v843_v14 = vld [vmem:[#allocation3 + $0x98] sm:$0xff] }
  0x1f   :  { %v865_v15 = vld [vmem:[#allocation3 + $0x148] sm:$0xff]  ;;  %v880_v16 = vld [vmem:[#allocation3 + $0x1c0] sm:$0xff]  ;;  %v879_v18 = vld [vmem:[#allocation3 + $0x1b8] sm:$0xff] }
  0x20   :  { %v863_v19 = vld [vmem:[#allocation3 + $0x138] sm:$0xff]  ;;  %v878_v20 = vld [vmem:[#allocation3 + $0x1b0] sm:$0xff] }
  0x9d   :  { %v67_v22 = vpop.xlane.xlu0 %66 }
  0x9e   :  { %v80_v25 = vrot.slane %v67_v22, %v79_v23  ;;  %v862_v22 = vld [vmem:[#allocation3 + $0x130] sm:$0xff] }
  0xa1   :  { %v72_v24 = vpop.xlane.xlu0 %71 }
  0xa2   :  { %v84_v27 = vrot.slane %v72_v24, %v79_v23  ;;  %v877_v23 = vld [vmem:[#allocation3 + $0x1a8] sm:$0xff]  ;;  %v827_v24 = vld [vmem:[#allocation3 + $0x18] sm:$0xff] }
  0xa4   :  { %v86_v28 = vsel %vm85_vm2, %v84_v27, %v80_v25  ;;  %v861_v25 = vld [vmem:[#allocation3 + $0x128] sm:$0xff]  ;;  %v876_v27 = vld [vmem:[#allocation3 + $0x1a0] sm:$0xff] }
  0xa5   :  { %v88_v29 = vadd.f32 %v86_v28, %v53_v26  ;;  %v842_v26 = vld [vmem:[#allocation3 + $0x90] sm:$0xff] }
  0xa6   :  { %v826_v28 = vld [vmem:[#allocation3 + $0x10] sm:$0xff] }
  0xa7   :  { %90 = vst.msk [vmem:[#allocation2] sm:$0x3] %vm51_vm1, %v88_v29  ;;  %v860_v29 = vld [vmem:[#allocation3 + $0x120] sm:$0xff] }
  0xae   :  { %v94_v31 = vld [vmem:[#allocation2] sm:$0x3] }
  0xaf   :  { %v95_v32 = vmul.f32 0.00390625, %v94_v31  ;;  %v2430_v31 = vld [vmem:[%s2628_s2 + $0x8] sm:$0xff] }
  0xb1   :  { %1849 = vmatmul.mubr.msk.f32.vlgmr.msra.gmra.mxu1 %vm204_vm3, %v95_v32  ;;  %1861 = vmatmul.mubr.msk.f32.vlgmr.msra.gmra.mxu0 %vm204_vm3, %v95_v32 }
  0xb2   :  { %1851 = vmatpush1.msk.msra.mxu1 %vm62_vm0, %v97_v13  ;;  %375 = vmatprep.mubr.f32.mxu1 %v2298_v10  ;;  %v881_v13 = vld [vmem:[#allocation3 + $0x1c8] sm:$0xff] }
  0xb3   :  { %1866 = vmatpush1.msk.msra.mxu0 %vm62_vm0, %v102_v17  ;;  %730 = vmatprep.mubr.f32.mxu0 %v2298_v10  ;;  %v864_v17 = vld [vmem:[#allocation3 + $0x140] sm:$0xff] }
  0xb4   :  { %1853 = vmatprep.subr.msk.mxu1 %vm62_vm0, %v198_v33  ;;  %1875 = vmatprep.subr.mxu0 %v855_v35  ;;  %v875_v33 = vld [vmem:[#allocation3 + $0x198] sm:$0xff]  ;;  %v825_v35 = vld [vmem:[#allocation3 + $0x8] sm:$0xff] }
  0xb5   :  { %1852 = vmatmul.mubr.msk.f32.vlgmr.msra.gmra.mxu1 %vm204_vm3, %v95_v32  ;;  %1867 = vmatmul.mubr.msk.f32.vlgmr.msra.gmra.mxu0 %vm204_vm3, %v95_v32 }
  0xb6   :  { %1854 = vmatpush1.msk.msra.mxu1 %vm62_vm0, %v98_v30  ;;  %446 = vmatprep.mubr.f32.mxu1 %v2298_v10  ;;  %v126_v30 = vsub.s32 4, %v2386_v21 }
  0xb7   :  { %1856 = vmatprep.subr.msk.mxu1 %vm62_vm0, %v199_v36  ;;  %1876 = vmatpush3.msra.mxu0 %v839_v38  ;;  %v859_v36 = vld [vmem:[#allocation3 + $0x118] sm:$0xff]  ;;  %v874_v38 = vld [vmem:[#allocation3 + $0x190] sm:$0xff] }
  0xb8   :  { %1877 = vmatprep.subr.mxu0 %v854_v39  ;;  %v824_v39 = vld [vmem:[#allocation3] sm:$0xff] }
  0xb9   :  { %1855 = vmatmul.mubr.msk.f32.vlgmr.msra.gmra.mxu1 %vm204_vm3, %v95_v32  ;;  %1878 = vmatpush3.msra.mxu0 %v838_v40  ;;  %v858_v40 = vld [vmem:[#allocation3 + $0x110] sm:$0xff] }
  0xba   :  { %1857 = vmatpush1.msk.msra.mxu1 %vm62_vm0, %v99_v34  ;;  %517 = vmatprep.mubr.f32.mxu1 %v2298_v10  ;;  %v2435_v34 = vrot.slane %v2430_v31, %v126_v30 }
  0xbb   :  { %1862 = vmatprep.subr.msk.mxu1 %vm62_vm0, %v201_v41  ;;  %1879 = vmatprep.subr.mxu0 %v853_v43  ;;  %v873_v41 = vld [vmem:[#allocation3 + $0x188] sm:$0xff] }
  0xbc   :  { %1880 = vmatpush3.msra.mxu0 %v837_v44  ;;  %v857_v43 = vld [vmem:[#allocation3 + $0x108] sm:$0xff]  ;;  %v872_v44 = vld [vmem:[#allocation3 + $0x180] sm:$0xff] }
  0xbd   :  { %1858 = vmatmul.mubr.msk.f32.vlgmr.msra.gmra.mxu1 %vm204_vm3, %v95_v32  ;;  %1881 = vmatprep.subr.mxu0 %v852_v45  ;;  %v856_v45 = vld [vmem:[#allocation3 + $0x100] sm:$0xff] }
  0xbe   :  { %1863 = vmatpush1.msk.msra.mxu1 %vm62_vm0, %v101_v37  ;;  %659 = vmatprep.mubr.f32.mxu1 %v2298_v10  ;;  %v840_v37 = vld [vmem:[#allocation3 + $0x80] sm:$0xff] }
  0xbf   :  { %1868 = vmatprep.subr.msk.mxu1 %vm62_vm0, %v203_v46  ;;  %1882 = vmatpush3.msra.mxu0 %v836_v47  ;;  %v951_v46 = vld [vmem:[#allocation3 + $0x3f8] sm:$0xff]  ;;  %v134_v47 = vsub.s32 6, %v2386_v21 }
  0xc0   :  { %1883 = vmatprep.subr.mxu0 %v851_v48 }
  0xc1   :  { %1864 = vmatmul.mubr.msk.f32.vlgmr.msra.gmra.mxu1 %vm204_vm3, %v95_v32  ;;  %1884 = vmatpush3.msra.mxu0 %v835_v49  ;;  %v2441_v48 = vrot.slane %v2430_v31, %v134_v47  ;;  %v110_v49 = vsub.s32 0, %v2386_v21 }
  0xc2   :  { %1869 = vmatpush1.msk.msra.mxu1 %vm62_vm0, %v103_v42  ;;  %801 = vmatprep.mubr.f32.mxu1 %v2298_v10  ;;  %v919_v42 = vld [vmem:[#allocation3 + $0x2f8] sm:$0xff] }
  0xc3   :  { %1910 = vmatprep.subr.mxu1 %v887_v50  ;;  %1885 = vmatprep.subr.mxu0 %v850_v51  ;;  %v2447_v50 = vld [vmem:[%s2628_s2] sm:$0xff]  ;;  %v114_v51 = vsub.s32 1, %v2386_v21 }
  0xc4   :  { %1886 = vmatpush3.msra.mxu0 %v834_v52  ;;  %v111_v52 = vrot.slane %v2447_v50, %v110_v49 }
  0xc5   :  { %1870 = vmatmul.mubr.msk.f32.vlgmr.msra.gmra.mxu1 %vm204_vm3, %v95_v32  ;;  %1887 = vmatprep.subr.mxu0 %v849_v53  ;;  %v841_v32 = vld [vmem:[#allocation3 + $0x88] sm:$0xff]  ;;  %v118_v53 = vsub.s32 2, %v2386_v21 }
  0xc6   :  { %1911 = vmatpush3.msra.mxu1 %v871_v54  ;;  %1888 = vmatpush3.msra.mxu0 %v833_v55  ;;  %v115_v54 = vrot.slane %v2447_v50, %v114_v51  ;;  %v122_v55 = vsub.s32 3, %v2386_v21 }
  0xc7   :  { %1912 = vmatprep.subr.mxu1 %v886_v56  ;;  %1889 = vmatprep.subr.mxu0 %v848_v57 }
  0xc8   :  { %1913 = vmatpush3.msra.mxu1 %v870_v58  ;;  %1890 = vmatpush3.msra.mxu0 %v832_v59  ;;  %v119_v59 = vrot.slane %v2447_v50, %v118_v53 }
  0xc9   :  { %1914 = vmatprep.subr.mxu1 %v885_v60  ;;  %1891 = vmatprep.subr.mxu0 %v847_v61  ;;  %v123_v61 = vrot.slane %v2447_v50, %v122_v55 }
  0xca   :  { %1915 = vmatpush3.msra.mxu1 %v869_v62  ;;  %1892 = vmatpush3.msra.mxu0 %v831_v63 }
  0xcb   :  { %1916 = vmatprep.subr.mxu1 %v884_v0  ;;  %1893 = vmatprep.subr.mxu0 %v846_v1  ;;  %v130_v0 = vsub.s32 5, %v2386_v21 }
  0xcc   :  { %1917 = vmatpush3.msra.mxu1 %v868_v2  ;;  %1894 = vmatpush3.msra.mxu0 %v830_v3 }
  0xcd   :  { %1918 = vmatprep.subr.mxu1 %v883_v4  ;;  %1895 = vmatprep.subr.mxu0 %v845_v5  ;;  %v903_v4 = vld [vmem:[#allocation3 + $0x278] sm:$0xff] }
  0xce   :  { %1919 = vmatpush3.msra.mxu1 %v867_v6  ;;  %1896 = vmatpush3.msra.mxu0 %v829_v7  ;;  %v918_v6 = vld [vmem:[#allocation3 + $0x2f0] sm:$0xff]  ;;  %v131_v7 = vrot.slane %v2447_v50, %v130_v0 }
  0xcf   :  { %1920 = vmatprep.subr.mxu1 %v882_v8  ;;  %1897 = vmatprep.subr.mxu0 %v844_v9  ;;  %v138_v8 = vsub.s32 7, %v2386_v21  ;;  %v1000_v21 = vld [vmem:[#allocation3 + $0x580] sm:$0xff] }
  0xd0   :  { %1921 = vmatpush3.msra.mxu1 %v866_v11  ;;  %1898 = vmatpush3.msra.mxu0 %v828_v12  ;;  %v902_v11 = vld [vmem:[#allocation3 + $0x270] sm:$0xff] }
  0xd1   :  { %1922 = vmatprep.subr.mxu1 %v881_v13  ;;  %1899 = vmatprep.subr.mxu0 %v843_v14  ;;  %v917_v13 = vld [vmem:[#allocation3 + $0x2e8] sm:$0xff] }
  0xd2   :  { %1923 = vmatpush3.msra.mxu1 %v865_v15  ;;  %1900 = vmatpush3.msra.mxu0 %v827_v24  ;;  %v900_v24 = vld [vmem:[#allocation3 + $0x260] sm:$0xff] }
  0xd3   :  { %1924 = vmatprep.subr.mxu1 %v880_v16  ;;  %1901 = vmatprep.subr.mxu0 %v842_v26  ;;  %v901_v16 = vld [vmem:[#allocation3 + $0x268] sm:$0xff] }
  0xd4   :  { %1925 = vmatpush3.msra.mxu1 %v864_v17  ;;  %1902 = vmatpush3.msra.mxu0 %v826_v28  ;;  %v935_v17 = vld [vmem:[#allocation3 + $0x378] sm:$0xff] }
  0xd5   :  { %1926 = vmatprep.subr.mxu1 %v879_v18  ;;  %1903 = vmatprep.subr.mxu0 %v841_v32  ;;  %v899_v32 = vld [vmem:[#allocation3 + $0x258] sm:$0xff] }
  0xd6   :  { %1927 = vmatpush3.msra.mxu1 %v863_v19  ;;  %1904 = vmatpush3.msra.mxu0 %v825_v35  ;;  %v916_v19 = vld [vmem:[#allocation3 + $0x2e0] sm:$0xff]  ;;  %v933_v35 = vld [vmem:[#allocation3 + $0x368] sm:$0xff] }
  0xd7   :  { %1928 = vmatprep.subr.mxu1 %v878_v20  ;;  %1905 = vmatprep.subr.mxu0 %v840_v37  ;;  %v950_v20 = vld [vmem:[#allocation3 + $0x3f0] sm:$0xff]  ;;  %v948_v37 = vld [vmem:[#allocation3 + $0x3e0] sm:$0xff] }
  0xd8   :  { %1929 = vmatpush3.msra.mxu1 %v862_v22  ;;  %1906 = vmatpush3.msra.mxu0 %v824_v39  ;;  %v139_v22 = vrot.slane %v2447_v50, %v138_v8 }
  0xd9   :  { %1930 = vmatprep.subr.mxu1 %v877_v23  ;;  %1945 = vmatprep.subr.mxu0 %v919_v42  ;;  %v947_v42 = vld [vmem:[#allocation3 + $0x3d8] sm:$0xff] }
  0xda   :  { %1931 = vmatpush3.msra.mxu1 %v861_v25  ;;  %v934_v25 = vld [vmem:[#allocation3 + $0x370] sm:$0xff] }
  0xdb   :  { %1932 = vmatprep.subr.mxu1 %v876_v27  ;;  %v915_v27 = vld [vmem:[#allocation3 + $0x2d8] sm:$0xff] }
  0xdc   :  { %1933 = vmatpush3.msra.mxu1 %v860_v29  ;;  %v949_v29 = vld [vmem:[#allocation3 + $0x3e8] sm:$0xff] }
  0xdd   :  { %1934 = vmatprep.subr.mxu1 %v875_v33 }
  0xde   :  { %1935 = vmatpush3.msra.mxu1 %v859_v36  ;;  %v914_v36 = vld [vmem:[#allocation3 + $0x2d0] sm:$0xff] }
  0xdf   :  { %1936 = vmatprep.subr.mxu1 %v874_v38  ;;  %v898_v38 = vld [vmem:[#allocation3 + $0x250] sm:$0xff] }
  0xe0   :  { %1937 = vmatpush3.msra.mxu1 %v858_v40  ;;  %v932_v40 = vld [vmem:[#allocation3 + $0x360] sm:$0xff] }
  0xe1   :  { %1938 = vmatprep.subr.mxu1 %v873_v41  ;;  %v913_v41 = vld [vmem:[#allocation3 + $0x2c8] sm:$0xff] }
  0xe2   :  { %1939 = vmatpush3.msra.mxu1 %v857_v43  ;;  %v897_v43 = vld [vmem:[#allocation3 + $0x248] sm:$0xff] }
  0xe3   :  { %1940 = vmatprep.subr.mxu1 %v872_v44  ;;  %v931_v44 = vld [vmem:[#allocation3 + $0x358] sm:$0xff] }
  0xe4   :  { %1941 = vmatpush3.msra.mxu1 %v856_v45  ;;  %v912_v45 = vld [vmem:[#allocation3 + $0x2c0] sm:$0xff] }
  0xe5   :  { %1980 = vmatprep.subr.mxu1 %v951_v46  ;;  %v946_v46 = vld [vmem:[#allocation3 + $0x3d0] sm:$0xff] }
 0x171   :  { %v306_v56 = vpop.f32.mrf.mxu1 }
 0x172   :  { %v307_v57 = vadd.f32 %v306_v56, %v111_v52  ;;  %v896_v52 = vld [vmem:[#allocation3 + $0x240] sm:$0xff]  ;;  %v911_v56 = vld [vmem:[#allocation3 + $0x2b8] sm:$0xff] }
 0x173   :  { %v308_v58 = vpop.f32.mrf.mxu1 }
 0x174   :  { %v309_v60 = vadd.f32 %v308_v58, %v115_v54  ;;  %v808_v1 = vmax.f32 %v307_v57, 0.0  ;;  %v930_v54 = vld [vmem:[#allocation3 + $0x350] sm:$0xff]  ;;  %v945_v57 = vld [vmem:[#allocation3 + $0x3c8] sm:$0xff]  ;;  %v895_v58 = vld [vmem:[#allocation3 + $0x238] sm:$0xff] }
 0x175   :  { %v377_v62 = vpop.f32.mrf.mxu1 }
 0x176   :  { %v809_v63 = vmax.f32 %v309_v60, 0.0  ;;  %v378_v2 = vadd.f32 %v377_v62, %v119_v59  ;;  %v929_v59 = vld [vmem:[#allocation3 + $0x348] sm:$0xff]  ;;  %v910_v60 = vld [vmem:[#allocation3 + $0x2b0] sm:$0xff] }
 0x177   :  { %v379_v3 = vpop.f32.mrf.mxu1  ;;  %v894_v62 = vld [vmem:[#allocation3 + $0x230] sm:$0xff] }
 0x178   :  { %v380_v5 = vadd.f32 %v379_v3, %v123_v61  ;;  %1151 = vmatprep.mubr.f32.mxu0 %v809_v63  ;;  %v810_v14 = vmax.f32 %v378_v2, 0.0  ;;  %v944_v61 = vld [vmem:[#allocation3 + $0x3c0] sm:$0xff]  ;;  %v943_v2 = vld [vmem:[#allocation3 + $0x3b8] sm:$0xff]  ;;  %v893_v3 = vld [vmem:[#allocation3 + $0x228] sm:$0xff] }
 0x179   :  { %v2469_v9 = vpop.f32.mrf.mxu1  ;;  %1152 = vmatmul.mubr.f32.vlgmr.msra.gmra.mxu0 %v808_v1  ;;  %v928_v63 = vld [vmem:[#allocation3 + $0x340] sm:$0xff]  ;;  %v909_v1 = vld [vmem:[#allocation3 + $0x2a8] sm:$0xff] }
 0x17a   :  { %v811_v12 = vmax.f32 %v380_v5, 0.0  ;;  %1946 = vmatpush3.msra.mxu0 %v903_v4  ;;  %v927_v4 = vld [vmem:[#allocation3 + $0x338] sm:$0xff]  ;;  %v908_v5 = vld [vmem:[#allocation3 + $0x2a0] sm:$0xff] }
 0x17b   :  { %1947 = vmatprep.subr.mxu0 %v918_v6  ;;  %v450_v15 = vpop.f32.mrf.mxu1  ;;  %v942_v6 = vld [vmem:[#allocation3 + $0x3b0] sm:$0xff] }
 0x17c   :  { %v451_v18 = vadd.f32 %v450_v15, %v131_v7  ;;  %1948 = vmatpush3.msra.mxu0 %v902_v11  ;;  %1221 = vmatprep.mubr.f32.mxu1 %v811_v12  ;;  %v892_v7 = vld [vmem:[#allocation3 + $0x220] sm:$0xff]  ;;  %v926_v11 = vld [vmem:[#allocation3 + $0x330] sm:$0xff]  ;;  %v2476_v12 = vpop.f32.mrf.mxu0  ;;  %v127_v15 = vrot.slane %v2447_v50, %v126_v30  ;;  %v905_v30 = vld [vmem:[#allocation3 + $0x288] sm:$0xff] }
 0x17d   :  { %1949 = vmatprep.subr.mxu0 %v917_v13  ;;  %v2474_v23 = vpop.f32.mrf.mxu1  ;;  %1222 = vmatmul.mubr.f32.vlgmr.msra.gmra.mxu1 %v810_v14  ;;  %v907_v13 = vld [vmem:[#allocation3 + $0x298] sm:$0xff]  ;;  %v941_v14 = vld [vmem:[#allocation3 + $0x3a8] sm:$0xff] }
 0x17e   :  { %v813_v26 = vmax.f32 %v451_v18, 0.0  ;;  %1950 = vmatpush3.msra.mxu0 %v901_v16  ;;  %1981 = vmatpush3.msra.mxu1 %v935_v17  ;;  %v891_v16 = vld [vmem:[#allocation3 + $0x218] sm:$0xff]  ;;  %v925_v17 = vld [vmem:[#allocation3 + $0x328] sm:$0xff]  ;;  %v906_v18 = vld [vmem:[#allocation3 + $0x290] sm:$0xff] }
 0x17f   :  { %1951 = vmatprep.subr.mxu0 %v916_v19  ;;  %1982 = vmatprep.subr.mxu1 %v950_v20  ;;  %v521_v28 = vpop.f32.mrf.mxu1  ;;  %v940_v19 = vld [vmem:[#allocation3 + $0x3a0] sm:$0xff]  ;;  %v147_v20 = vrot.slane %v2430_v31, %v114_v51  ;;  %v135_v51 = vrot.slane %v2447_v50, %v134_v47  ;;  %v983_v47 = vld [vmem:[#allocation3 + $0x4f8] sm:$0xff]  ;;  %v921_v50 = vld [vmem:[#allocation3 + $0x308] sm:$0xff] }
 0x180   :  { %v522_v33 = vadd.f32 %v521_v28, %v139_v22  ;;  %1952 = vmatpush3.msra.mxu0 %v900_v24  ;;  %1983 = vmatpush3.msra.mxu1 %v934_v25  ;;  %v890_v22 = vld [vmem:[#allocation3 + $0x210] sm:$0xff]  ;;  %v924_v24 = vld [vmem:[#allocation3 + $0x320] sm:$0xff]  ;;  %v592_v25 = vpop.f32.mrf.mxu0 }
 0x181   :  { %1953 = vmatprep.subr.mxu0 %v915_v27  ;;  %1291 = vmatprep.mubr.f32.mxu0 %v813_v26  ;;  %v939_v26 = vld [vmem:[#allocation3 + $0x398] sm:$0xff]  ;;  %v449_v27 = vadd.f32 %v2469_v9, %v127_v15  ;;  %v2485_v28 = vpop.f32.mrf.mxu1  ;;  %v155_v9 = vrot.slane %v2430_v31, %v122_v55 }
 0x182   :  { %v815_v39 = vmax.f32 %v522_v33, 0.0  ;;  %1984 = vmatprep.subr.mxu1 %v949_v29  ;;  %1954 = vmatpush3.msra.mxu0 %v899_v32  ;;  %v889_v29 = vld [vmem:[#allocation3 + $0x208] sm:$0xff]  ;;  %v923_v32 = vld [vmem:[#allocation3 + $0x318] sm:$0xff]  ;;  %v904_v33 = vld [vmem:[#allocation3 + $0x280] sm:$0xff] }
 0x183   :  { %1985 = vmatpush3.msra.mxu1 %v933_v35  ;;  %1955 = vmatprep.subr.mxu0 %v914_v36  ;;  %v938_v35 = vld [vmem:[#allocation3 + $0x390] sm:$0xff]  ;;  %v593_v36 = vadd.f32 %v592_v25, %v147_v20  ;;  %v1011_v15 = vld [vmem:[#allocation3 + $0x5d8] sm:$0xff]  ;;  %v960_v20 = vld [vmem:[#allocation3 + $0x440] sm:$0xff] }
 0x184   :  { %1986 = vmatprep.subr.mxu1 %v948_v37  ;;  %1956 = vmatpush3.msra.mxu0 %v898_v38  ;;  %v888_v37 = vld [vmem:[#allocation3 + $0x200] sm:$0xff]  ;;  %v922_v38 = vld [vmem:[#allocation3 + $0x310] sm:$0xff]  ;;  %v1009_v25 = vld [vmem:[#allocation3 + $0x5c8] sm:$0xff] }
 0x185   :  { %1987 = vmatpush3.msra.mxu1 %v932_v40  ;;  %1957 = vmatprep.subr.mxu0 %v913_v41  ;;  %v812_v40 = vmax.f32 %v449_v27, 0.0  ;;  %v663_v41 = vpop.f32.mrf.mxu1  ;;  %v974_v27 = vld [vmem:[#allocation3 + $0x4b0] sm:$0xff] }
 0x186   :  { %1988 = vmatprep.subr.mxu1 %v947_v42  ;;  %1361 = vmatprep.mubr.f32.mxu1 %v815_v39  ;;  %v937_v39 = vld [vmem:[#allocation3 + $0x388] sm:$0xff]  ;;  %v520_v42 = vadd.f32 %v2474_v23, %v135_v51  ;;  %v664_v55 = vadd.f32 %v663_v41, %v155_v9  ;;  %v1015_v23 = vld [vmem:[#allocation3 + $0x5f8] sm:$0xff]  ;;  %v992_v51 = vld [vmem:[#allocation3 + $0x540] sm:$0xff]  ;;  %v2494_v41 = vpop.f32.mrf.mxu0 }
 0x187   :  { %1958 = vmatpush3.msra.mxu0 %v897_v43  ;;  %1989 = vmatpush3.msra.mxu1 %v931_v44  ;;  %v967_v43 = vld [vmem:[#allocation3 + $0x478] sm:$0xff]  ;;  %v817_v44 = vmax.f32 %v593_v36, 0.0  ;;  %v957_v36 = vld [vmem:[#allocation3 + $0x428] sm:$0xff]  ;;  %v1006_v9 = vld [vmem:[#allocation3 + $0x5b0] sm:$0xff] }
 0x188   :  { %1959 = vmatprep.subr.mxu0 %v912_v45  ;;  %1990 = vmatprep.subr.mxu1 %v946_v46  ;;  %v936_v45 = vld [vmem:[#allocation3 + $0x380] sm:$0xff]  ;;  %v982_v46 = vld [vmem:[#allocation3 + $0x4f0] sm:$0xff] }
 0x189   :  { %1960 = vmatpush3.msra.mxu0 %v896_v52  ;;  %1991 = vmatpush3.msra.mxu1 %v930_v54  ;;  %v920_v52 = vld [vmem:[#allocation3 + $0x300] sm:$0xff]  ;;  %v966_v54 = vld [vmem:[#allocation3 + $0x470] sm:$0xff] }
 0x18a   :  { %1961 = vmatprep.subr.mxu0 %v911_v56  ;;  %1992 = vmatprep.subr.mxu1 %v945_v57  ;;  %v981_v56 = vld [vmem:[#allocation3 + $0x4e8] sm:$0xff]  ;;  %v814_v57 = vmax.f32 %v520_v42, 0.0  ;;  %v143_v42 = vrot.slane %v2430_v31, %v110_v49 }
 0x18b   :  { %1962 = vmatpush3.msra.mxu0 %v895_v58  ;;  %1993 = vmatpush3.msra.mxu1 %v929_v59  ;;  %v965_v58 = vld [vmem:[#allocation3 + $0x468] sm:$0xff]  ;;  %v999_v59 = vld [vmem:[#allocation3 + $0x578] sm:$0xff] }
 0x18c   :  { %1963 = vmatprep.subr.mxu0 %v910_v60  ;;  %1994 = vmatprep.subr.mxu1 %v944_v61  ;;  %v819_v60 = vmax.f32 %v664_v55, 0.0  ;;  %v980_v61 = vld [vmem:[#allocation3 + $0x4e0] sm:$0xff]  ;;  %v163_v55 = vrot.slane %v2430_v31, %v130_v0  ;;  %v969_v49 = vld [vmem:[#allocation3 + $0x488] sm:$0xff]  ;;  %v151_v0 = vrot.slane %v2430_v31, %v118_v53  ;;  %v1047_v53 = vld [vmem:[#allocation3 + $0x6f8] sm:$0xff] }
 0x18d   :  { %1964 = vmatpush3.msra.mxu0 %v894_v62  ;;  %1995 = vmatpush3.msra.mxu1 %v928_v63  ;;  %v1014_v62 = vld [vmem:[#allocation3 + $0x5f0] sm:$0xff]  ;;  %v964_v63 = vld [vmem:[#allocation3 + $0x460] sm:$0xff] }
 0x18e   :  { %1965 = vmatprep.subr.mxu0 %v909_v1  ;;  %1996 = vmatprep.subr.mxu1 %v943_v2  ;;  %v998_v1 = vld [vmem:[#allocation3 + $0x570] sm:$0xff]  ;;  %v979_v2 = vld [vmem:[#allocation3 + $0x4d8] sm:$0xff] }
 0x18f   :  { %1966 = vmatpush3.msra.mxu0 %v893_v3  ;;  %1997 = vmatpush3.msra.mxu1 %v927_v4  ;;  %v1013_v3 = vld [vmem:[#allocation3 + $0x5e8] sm:$0xff]  ;;  %v963_v4 = vld [vmem:[#allocation3 + $0x458] sm:$0xff] }
 0x190   :  { %1967 = vmatprep.subr.mxu0 %v908_v5  ;;  %1998 = vmatprep.subr.mxu1 %v942_v6  ;;  %v997_v5 = vld [vmem:[#allocation3 + $0x568] sm:$0xff]  ;;  %v978_v6 = vld [vmem:[#allocation3 + $0x4d0] sm:$0xff] }
 0x191   :  { %1968 = vmatpush3.msra.mxu0 %v892_v7  ;;  %1999 = vmatpush3.msra.mxu1 %v926_v11  ;;  %v1012_v7 = vld [vmem:[#allocation3 + $0x5e0] sm:$0xff]  ;;  %v962_v11 = vld [vmem:[#allocation3 + $0x450] sm:$0xff] }
 0x192   :  { %1969 = vmatprep.subr.mxu0 %v907_v13  ;;  %2000 = vmatprep.subr.mxu1 %v941_v14  ;;  %v996_v13 = vld [vmem:[#allocation3 + $0x560] sm:$0xff]  ;;  %v977_v14 = vld [vmem:[#allocation3 + $0x4c8] sm:$0xff] }
 0x193   :  { %1970 = vmatpush3.msra.mxu0 %v891_v16  ;;  %2001 = vmatpush3.msra.mxu1 %v925_v17  ;;  %v961_v16 = vld [vmem:[#allocation3 + $0x448] sm:$0xff]  ;;  %v995_v17 = vld [vmem:[#allocation3 + $0x558] sm:$0xff] }
 0x194   :  { %1971 = vmatprep.subr.mxu0 %v906_v18  ;;  %2002 = vmatprep.subr.mxu1 %v940_v19  ;;  %v976_v18 = vld [vmem:[#allocation3 + $0x4c0] sm:$0xff]  ;;  %v1010_v19 = vld [vmem:[#allocation3 + $0x5d0] sm:$0xff] }
 0x195   :  { %1972 = vmatpush3.msra.mxu0 %v890_v22  ;;  %2003 = vmatpush3.msra.mxu1 %v924_v24  ;;  %v994_v22 = vld [vmem:[#allocation3 + $0x550] sm:$0xff]  ;;  %v975_v24 = vld [vmem:[#allocation3 + $0x4b8] sm:$0xff] }
 0x196   :  { %1973 = vmatprep.subr.mxu0 %v905_v30  ;;  %2004 = vmatprep.subr.mxu1 %v939_v26  ;;  %v959_v30 = vld [vmem:[#allocation3 + $0x438] sm:$0xff]  ;;  %v993_v26 = vld [vmem:[#allocation3 + $0x548] sm:$0xff] }
 0x197   :  { %1974 = vmatpush3.msra.mxu0 %v889_v29  ;;  %2005 = vmatpush3.msra.mxu1 %v923_v32  ;;  %v1008_v29 = vld [vmem:[#allocation3 + $0x5c0] sm:$0xff]  ;;  %v958_v32 = vld [vmem:[#allocation3 + $0x430] sm:$0xff] }
 0x198   :  { %1975 = vmatprep.subr.mxu0 %v904_v33  ;;  %2006 = vmatprep.subr.mxu1 %v938_v35  ;;  %v973_v33 = vld [vmem:[#allocation3 + $0x4a8] sm:$0xff]  ;;  %v1007_v35 = vld [vmem:[#allocation3 + $0x5b8] sm:$0xff] }
 0x199   :  { %1976 = vmatpush3.msra.mxu0 %v888_v37  ;;  %2007 = vmatpush3.msra.mxu1 %v922_v38  ;;  %v991_v37 = vld [vmem:[#allocation3 + $0x538] sm:$0xff]  ;;  %v972_v38 = vld [vmem:[#allocation3 + $0x4a0] sm:$0xff] }
 0x19a   :  { %1292 = vmatmul.mubr.f32.vlgmr.msra.gmra.mxu0 %v812_v40  ;;  %2008 = vmatprep.subr.mxu1 %v937_v39  ;;  %v956_v39 = vld [vmem:[#allocation3 + $0x420] sm:$0xff]  ;;  %v990_v40 = vld [vmem:[#allocation3 + $0x530] sm:$0xff] }
 0x19b   :  { %2015 = vmatprep.subr.mxu0 %v983_v47  ;;  %2009 = vmatpush3.msra.mxu1 %v921_v50  ;;  %v971_v47 = vld [vmem:[#allocation3 + $0x498] sm:$0xff]  ;;  %v1005_v50 = vld [vmem:[#allocation3 + $0x5a8] sm:$0xff] }
 0x19c   :  { %2016 = vmatpush3.msra.mxu0 %v967_v43  ;;  %1431 = vmatprep.mubr.f32.mxu0 %v817_v44  ;;  %v955_v43 = vld [vmem:[#allocation3 + $0x418] sm:$0xff]  ;;  %v989_v44 = vld [vmem:[#allocation3 + $0x528] sm:$0xff] }
 0x19d   :  { %2010 = vmatprep.subr.mxu1 %v936_v45  ;;  %2017 = vmatprep.subr.mxu0 %v982_v46  ;;  %v970_v45 = vld [vmem:[#allocation3 + $0x490] sm:$0xff]  ;;  %v1004_v46 = vld [vmem:[#allocation3 + $0x5a0] sm:$0xff] }
 0x19e   :  { %2011 = vmatpush3.msra.mxu1 %v920_v52  ;;  %2018 = vmatpush3.msra.mxu0 %v966_v54  ;;  %v954_v52 = vld [vmem:[#allocation3 + $0x410] sm:$0xff]  ;;  %v988_v54 = vld [vmem:[#allocation3 + $0x520] sm:$0xff] }
 0x19f   :  { %1362 = vmatmul.mubr.f32.vlgmr.msra.gmra.mxu1 %v814_v57  ;;  %2019 = vmatprep.subr.mxu0 %v981_v56  ;;  %v734_v56 = vpop.f32.mrf.mxu0  ;;  %v1003_v57 = vld [vmem:[#allocation3 + $0x598] sm:$0xff] }
 0x1a0   :  { %2050 = vmatprep.subr.mxu1 %v1015_v23  ;;  %2020 = vmatpush3.msra.mxu0 %v965_v58  ;;  %v591_v23 = vadd.f32 %v2476_v12, %v143_v42  ;;  %v2503_v58 = vpop.f32.mrf.mxu1  ;;  %v171_v12 = vrot.slane %v2430_v31, %v138_v8  ;;  %v984_v8 = vld [vmem:[#allocation3 + $0x500] sm:$0xff]  ;;  %v1058_v42 = vld [vmem:[#allocation3 + $0x750] sm:$0xff] }
 0x1a1   :  { %2051 = vmatpush3.msra.mxu1 %v999_v59  ;;  %1501 = vmatprep.mubr.f32.mxu1 %v819_v60  ;;  %v953_v59 = vld [vmem:[#allocation3 + $0x408] sm:$0xff]  ;;  %v987_v60 = vld [vmem:[#allocation3 + $0x518] sm:$0xff] }
 0x1a2   :  { %2021 = vmatprep.subr.mxu0 %v980_v61  ;;  %2052 = vmatprep.subr.mxu1 %v1014_v62  ;;  %v968_v61 = vld [vmem:[#allocation3 + $0x480] sm:$0xff]  ;;  %v1002_v62 = vld [vmem:[#allocation3 + $0x590] sm:$0xff] }
 0x1a3   :  { %2022 = vmatpush3.msra.mxu0 %v964_v63  ;;  %2053 = vmatpush3.msra.mxu1 %v998_v1  ;;  %v735_v63 = vadd.f32 %v734_v56, %v163_v55  ;;  %v952_v1 = vld [vmem:[#allocation3 + $0x400] sm:$0xff]  ;;  %v1038_v55 = vld [vmem:[#allocation3 + $0x6b0] sm:$0xff] }
 0x1a4   :  { %2023 = vmatprep.subr.mxu0 %v979_v2  ;;  %2054 = vmatprep.subr.mxu1 %v1013_v3  ;;  %v986_v2 = vld [vmem:[#allocation3 + $0x510] sm:$0xff]  ;;  %v1001_v3 = vld [vmem:[#allocation3 + $0x588] sm:$0xff]  ;;  %v1056_v56 = vld [vmem:[#allocation3 + $0x740] sm:$0xff] }
 0x1a5   :  { %2024 = vmatpush3.msra.mxu0 %v963_v4  ;;  %2055 = vmatpush3.msra.mxu1 %v997_v5  ;;  %v816_v4 = vmax.f32 %v591_v23, 0.0  ;;  %v805_v5 = vpop.f32.mrf.mxu1  ;;  %v1021_v23 = vld [vmem:[#allocation3 + $0x628] sm:$0xff] }
 0x1a6   :  { %2025 = vmatprep.subr.mxu0 %v978_v6  ;;  %2056 = vmatprep.subr.mxu1 %v1012_v7  ;;  %v985_v6 = vld [vmem:[#allocation3 + $0x508] sm:$0xff]  ;;  %v662_v7 = vadd.f32 %v2485_v28, %v151_v0  ;;  %v806_v31 = vadd.f32 %v805_v5, %v171_v12  ;;  %v1079_v28 = vld [vmem:[#allocation3 + $0x7f8] sm:$0xff]  ;;  %v1070_v0 = vld [vmem:[#allocation3 + $0x7b0] sm:$0xff] }
 0x1a7   :  { %2026 = vmatpush3.msra.mxu0 %v962_v11  ;;  %2057 = vmatpush3.msra.mxu1 %v996_v13  ;;  %v1031_v11 = vld [vmem:[#allocation3 + $0x678] sm:$0xff]  ;;  %v821_v13 = vmax.f32 %v735_v63, 0.0  ;;  %v1053_v12 = vld [vmem:[#allocation3 + $0x728] sm:$0xff]  ;;  %v1018_v5 = vld [vmem:[#allocation3 + $0x610] sm:$0xff] }
 0x1a8   :  { %2027 = vmatprep.subr.mxu0 %v977_v14  ;;  %2058 = vmatprep.subr.mxu1 %v1011_v15  ;;  %v1046_v14 = vld [vmem:[#allocation3 + $0x6f0] sm:$0xff]  ;;  %v1035_v63 = vld [vmem:[#allocation3 + $0x698] sm:$0xff] }
 0x1a9   :  { %2028 = vmatpush3.msra.mxu0 %v961_v16  ;;  %2059 = vmatpush3.msra.mxu1 %v995_v17  ;;  %v1030_v15 = vld [vmem:[#allocation3 + $0x670] sm:$0xff]  ;;  %v1045_v16 = vld [vmem:[#allocation3 + $0x6e8] sm:$0xff]  ;;  %v818_v17 = vmax.f32 %v662_v7, 0.0  ;;  %v1067_v7 = vld [vmem:[#allocation3 + $0x798] sm:$0xff] }
 0x1aa   :  { %2029 = vmatprep.subr.mxu0 %v976_v18  ;;  %2060 = vmatprep.subr.mxu1 %v1010_v19  ;;  %v1029_v18 = vld [vmem:[#allocation3 + $0x668] sm:$0xff]  ;;  %v1063_v19 = vld [vmem:[#allocation3 + $0x778] sm:$0xff] }
 0x1ab   :  { %2030 = vmatpush3.msra.mxu0 %v960_v20  ;;  %2061 = vmatpush3.msra.mxu1 %v994_v22  ;;  %v823_v20 = vmax.f32 %v806_v31, 0.0  ;;  %v1044_v22 = vld [vmem:[#allocation3 + $0x6e0] sm:$0xff]  ;;  %v1066_v31 = vld [vmem:[#allocation3 + $0x790] sm:$0xff] }
 0x1ac   :  { %2031 = vmatprep.subr.mxu0 %v975_v24  ;;  %2062 = vmatprep.subr.mxu1 %v1009_v25  ;;  %v1078_v24 = vld [vmem:[#allocation3 + $0x7f0] sm:$0xff]  ;;  %v1028_v25 = vld [vmem:[#allocation3 + $0x660] sm:$0xff] }
 0x1ad   :  { %2032 = vmatpush3.msra.mxu0 %v959_v30  ;;  %2063 = vmatpush3.msra.mxu1 %v993_v26  ;;  %v1062_v30 = vld [vmem:[#allocation3 + $0x770] sm:$0xff]  ;;  %v1043_v26 = vld [vmem:[#allocation3 + $0x6d8] sm:$0xff] }
 0x1ae   :  { %2033 = vmatprep.subr.mxu0 %v974_v27  ;;  %2064 = vmatprep.subr.mxu1 %v1008_v29  ;;  %v1077_v27 = vld [vmem:[#allocation3 + $0x7e8] sm:$0xff]  ;;  %v1027_v29 = vld [vmem:[#allocation3 + $0x658] sm:$0xff] }
 0x1af   :  { %2034 = vmatpush3.msra.mxu0 %v958_v32  ;;  %2065 = vmatpush3.msra.mxu1 %v992_v51  ;;  %v1061_v32 = vld [vmem:[#allocation3 + $0x768] sm:$0xff]  ;;  %v1042_v51 = vld [vmem:[#allocation3 + $0x6d0] sm:$0xff] }
 0x1b0   :  { %2035 = vmatprep.subr.mxu0 %v973_v33  ;;  %2066 = vmatprep.subr.mxu1 %v1007_v35  ;;  %v1076_v33 = vld [vmem:[#allocation3 + $0x7e0] sm:$0xff]  ;;  %v1026_v35 = vld [vmem:[#allocation3 + $0x650] sm:$0xff] }
 0x1b1   :  { %2036 = vmatpush3.msra.mxu0 %v957_v36  ;;  %2067 = vmatpush3.msra.mxu1 %v991_v37  ;;  %v1060_v36 = vld [vmem:[#allocation3 + $0x760] sm:$0xff]  ;;  %v1041_v37 = vld [vmem:[#allocation3 + $0x6c8] sm:$0xff] }
 0x1b2   :  { %2037 = vmatprep.subr.mxu0 %v972_v38  ;;  %2068 = vmatprep.subr.mxu1 %v1006_v9  ;;  %v1075_v38 = vld [vmem:[#allocation3 + $0x7d8] sm:$0xff]  ;;  %v1025_v9 = vld [vmem:[#allocation3 + $0x648] sm:$0xff] }
 0x1b3   :  { %2038 = vmatpush3.msra.mxu0 %v956_v39  ;;  %2069 = vmatpush3.msra.mxu1 %v990_v40  ;;  %v1059_v39 = vld [vmem:[#allocation3 + $0x758] sm:$0xff]  ;;  %v1040_v40 = vld [vmem:[#allocation3 + $0x6c0] sm:$0xff] }
 0x1b4   :  { %2039 = vmatprep.subr.mxu0 %v971_v47  ;;  %2070 = vmatprep.subr.mxu1 %v1005_v50  ;;  %v1074_v47 = vld [vmem:[#allocation3 + $0x7d0] sm:$0xff]  ;;  %v1024_v50 = vld [vmem:[#allocation3 + $0x640] sm:$0xff] }
 0x1b5   :  { %2040 = vmatpush3.msra.mxu0 %v955_v43  ;;  %2071 = vmatpush3.msra.mxu1 %v989_v44  ;;  %v1039_v43 = vld [vmem:[#allocation3 + $0x6b8] sm:$0xff]  ;;  %v1073_v44 = vld [vmem:[#allocation3 + $0x7c8] sm:$0xff] }
 0x1b6   :  { %2041 = vmatprep.subr.mxu0 %v970_v45  ;;  %2072 = vmatprep.subr.mxu1 %v1004_v46  ;;  %v1023_v45 = vld [vmem:[#allocation3 + $0x638] sm:$0xff]  ;;  %v1057_v46 = vld [vmem:[#allocation3 + $0x748] sm:$0xff] }
 0x1b7   :  { %2042 = vmatpush3.msra.mxu0 %v954_v52  ;;  %2073 = vmatpush3.msra.mxu1 %v988_v54  ;;  %v1072_v52 = vld [vmem:[#allocation3 + $0x7c0] sm:$0xff]  ;;  %v1022_v54 = vld [vmem:[#allocation3 + $0x630] sm:$0xff] }
 0x1b8   :  { %2043 = vmatprep.subr.mxu0 %v969_v49  ;;  %2074 = vmatprep.subr.mxu1 %v1003_v57  ;;  %v1037_v49 = vld [vmem:[#allocation3 + $0x6a8] sm:$0xff]  ;;  %v1071_v57 = vld [vmem:[#allocation3 + $0x7b8] sm:$0xff] }
 0x1b9   :  { %2044 = vmatpush3.msra.mxu0 %v953_v59  ;;  %2075 = vmatpush3.msra.mxu1 %v987_v60  ;;  %v1055_v59 = vld [vmem:[#allocation3 + $0x738] sm:$0xff]  ;;  %v1036_v60 = vld [vmem:[#allocation3 + $0x6a0] sm:$0xff] }
 0x1ba   :  { %2045 = vmatprep.subr.mxu0 %v968_v61  ;;  %2076 = vmatprep.subr.mxu1 %v1002_v62  ;;  %v1020_v61 = vld [vmem:[#allocation3 + $0x620] sm:$0xff]  ;;  %v1054_v62 = vld [vmem:[#allocation3 + $0x730] sm:$0xff] }
 0x1bb   :  { %2046 = vmatpush3.msra.mxu0 %v952_v1  ;;  %2077 = vmatpush3.msra.mxu1 %v986_v2  ;;  %v1069_v1 = vld [vmem:[#allocation3 + $0x7a8] sm:$0xff]  ;;  %v1019_v2 = vld [vmem:[#allocation3 + $0x618] sm:$0xff] }
 0x1bc   :  { %1432 = vmatmul.mubr.f32.vlgmr.msra.gmra.mxu0 %v816_v4  ;;  %2078 = vmatprep.subr.mxu1 %v1001_v3  ;;  %v1034_v3 = vld [vmem:[#allocation3 + $0x690] sm:$0xff]  ;;  %v1068_v4 = vld [vmem:[#allocation3 + $0x7a0] sm:$0xff] }
 0x1bd   :  { %2085 = vmatprep.subr.mxu0 %v1047_v53  ;;  %2079 = vmatpush3.msra.mxu1 %v985_v6  ;;  %v1052_v53 = vld [vmem:[#allocation3 + $0x720] sm:$0xff]  ;;  %v1033_v6 = vld [vmem:[#allocation3 + $0x688] sm:$0xff] }
 0x1be   :  { %2086 = vmatpush3.msra.mxu0 %v1031_v11  ;;  %1571 = vmatprep.mubr.f32.mxu0 %v821_v13  ;;  %v733_v11 = vadd.f32 %v2494_v41, %v2435_v34  ;;  %v1017_v13 = vld [vmem:[#allocation3 + $0x608] sm:$0xff]  ;;  %v1064_v41 = vld [vmem:[#allocation3 + $0x780] sm:$0xff] }
 0x1bf   :  { %2080 = vmatprep.subr.mxu1 %v1000_v21  ;;  %2087 = vmatprep.subr.mxu0 %v1046_v14  ;;  %v1051_v21 = vld [vmem:[#allocation3 + $0x718] sm:$0xff]  ;;  %v1032_v14 = vld [vmem:[#allocation3 + $0x680] sm:$0xff]  ;;  %v1049_v34 = vld [vmem:[#allocation3 + $0x708] sm:$0xff] }
 0x1c0   :  { %2081 = vmatpush3.msra.mxu1 %v984_v8  ;;  %2088 = vmatpush3.msra.mxu0 %v1030_v15  ;;  %v1016_v8 = vld [vmem:[#allocation3 + $0x600] sm:$0xff]  ;;  %v1050_v15 = vld [vmem:[#allocation3 + $0x710] sm:$0xff] }
 0x1c1   :  { %1502 = vmatmul.mubr.f32.vlgmr.msra.gmra.mxu1 %v818_v17  ;;  %2089 = vmatprep.subr.mxu0 %v1045_v16  ;;  %v1065_v16 = vld [vmem:[#allocation3 + $0x788] sm:$0xff]  ;;  %v820_v17 = vmax.f32 %v733_v11, 0.0 }
 0x1c2   :  { %2120 = vmatprep.subr.mxu1 %v1079_v28  ;;  %2090 = vmatpush3.msra.mxu0 %v1029_v18  ;;  %v804_v28 = vadd.f32 %v2503_v58, %v2441_v48  ;;  %v1048_v18 = vld [vmem:[#allocation3 + $0x700] sm:$0xff]  ;;  %v1663_v48 = vld [vmem:[%s2631_s5 + $0x78] sm:$0xff]  ;;  %v1662_v58 = vld [vmem:[%s2631_s5 + $0x70] sm:$0xff] }
 0x1c3   :  { %2121 = vmatpush3.msra.mxu1 %v1063_v19  ;;  %1641 = vmatprep.mubr.f32.mxu1 %v823_v20  ;;  %v1661_v20 = vld [vmem:[%s2631_s5 + $0x68] sm:$0xff] }
 0x1c4   :  { %2091 = vmatprep.subr.mxu0 %v1044_v22  ;;  %2122 = vmatprep.subr.mxu1 %v1078_v24  ;;  %v822_v19 = vmax.f32 %v804_v28, 0.0  ;;  %v1660_v22 = vld [vmem:[%s2631_s5 + $0x60] sm:$0xff]  ;;  %v1659_v24 = vld [vmem:[%s2631_s5 + $0x58] sm:$0xff] }
 0x1c5   :  { %2092 = vmatpush3.msra.mxu0 %v1028_v25  ;;  %2123 = vmatpush3.msra.mxu1 %v1062_v30  ;;  %v1658_v25 = vld [vmem:[%s2631_s5 + $0x50] sm:$0xff]  ;;  %v1657_v30 = vld [vmem:[%s2631_s5 + $0x48] sm:$0xff]  ;;  %v1872_v28 = vld [vmem:[%s2632_s6] ss:$0 sm:$0xff] }
 0x1c6   :  { %2093 = vmatprep.subr.mxu0 %v1043_v26  ;;  %2124 = vmatprep.subr.mxu1 %v1077_v27  ;;  %v1656_v26 = vld [vmem:[%s2631_s5 + $0x40] sm:$0xff]  ;;  %v1655_v27 = vld [vmem:[%s2631_s5 + $0x38] sm:$0xff] }
 0x1c7   :  { %2094 = vmatpush3.msra.mxu0 %v1027_v29  ;;  %2125 = vmatpush3.msra.mxu1 %v1061_v32  ;;  %v1654_v29 = vld [vmem:[%s2631_s5 + $0x30] sm:$0xff]  ;;  %v1653_v32 = vld [vmem:[%s2631_s5 + $0x28] sm:$0xff] }
 0x1c8   :  { %2095 = vmatprep.subr.mxu0 %v1042_v51  ;;  %2126 = vmatprep.subr.mxu1 %v1076_v33  ;;  %v1652_v51 = vld [vmem:[%s2631_s5 + $0x20] sm:$0xff]  ;;  %v1651_v33 = vld [vmem:[%s2631_s5 + $0x18] sm:$0xff] }
 0x1c9   :  { %2096 = vmatpush3.msra.mxu0 %v1026_v35  ;;  %2127 = vmatpush3.msra.mxu1 %v1060_v36  ;;  %v1650_v35 = vld [vmem:[%s2631_s5 + $0x10] sm:$0xff]  ;;  %v1649_v36 = vld [vmem:[%s2631_s5 + $0x8] sm:$0xff] }
 0x1ca   :  { %2097 = vmatprep.subr.mxu0 %v1041_v37  ;;  %2128 = vmatprep.subr.mxu1 %v1075_v38  ;;  %v1648_v37 = vld [vmem:[%s2631_s5] sm:$0xff]  ;;  %v1749_v38 = vld [vmem:[%s2633_s7 + $0x38] sm:$0xff] }
 0x1cb   :  { %2098 = vmatpush3.msra.mxu0 %v1025_v9  ;;  %2129 = vmatpush3.msra.mxu1 %v1059_v39  ;;  %v1748_v9 = vld [vmem:[%s2633_s7 + $0x30] sm:$0xff]  ;;  %v1747_v39 = vld [vmem:[%s2633_s7 + $0x28] sm:$0xff] }
 0x1cc   :  { %2099 = vmatprep.subr.mxu0 %v1040_v40  ;;  %2130 = vmatprep.subr.mxu1 %v1074_v47  ;;  %v1746_v40 = vld [vmem:[%s2633_s7 + $0x20] sm:$0xff]  ;;  %v1745_v47 = vld [vmem:[%s2633_s7 + $0x18] sm:$0xff] }
 0x1cd   :  { %2100 = vmatpush3.msra.mxu0 %v1024_v50  ;;  %2131 = vmatpush3.msra.mxu1 %v1058_v42 }
 0x1ce   :  { %2101 = vmatprep.subr.mxu0 %v1039_v43  ;;  %2132 = vmatprep.subr.mxu1 %v1073_v44 }
 0x1cf   :  { %2102 = vmatpush3.msra.mxu0 %v1023_v45  ;;  %2133 = vmatpush3.msra.mxu1 %v1057_v46 }
 0x1d0   :  { %2103 = vmatprep.subr.mxu0 %v1038_v55  ;;  %2134 = vmatprep.subr.mxu1 %v1072_v52 }
 0x1d1   :  { %2104 = vmatpush3.msra.mxu0 %v1022_v54  ;;  %2135 = vmatpush3.msra.mxu1 %v1056_v56  ;;  %v1871_v54 = vld [vmem:[%s2630_s4] ss:$0 sm:$0xff] }
 0x1d2   :  { %2105 = vmatprep.subr.mxu0 %v1037_v49  ;;  %2136 = vmatprep.subr.mxu1 %v1071_v57 }
 0x1d3   :  { %2106 = vmatpush3.msra.mxu0 %v1021_v23  ;;  %2137 = vmatpush3.msra.mxu1 %v1055_v59 }
 0x1d4   :  { %2107 = vmatprep.subr.mxu0 %v1036_v60  ;;  %2138 = vmatprep.subr.mxu1 %v1070_v0 }
 0x1d5   :  { %2108 = vmatpush3.msra.mxu0 %v1020_v61  ;;  %2139 = vmatpush3.msra.mxu1 %v1054_v62 }
 0x1d6   :  { %2109 = vmatprep.subr.mxu0 %v1035_v63  ;;  %2140 = vmatprep.subr.mxu1 %v1069_v1 }
 0x1d7   :  { %2110 = vmatpush3.msra.mxu0 %v1019_v2  ;;  %2141 = vmatpush3.msra.mxu1 %v1053_v12 }
 0x1d8   :  { %2111 = vmatprep.subr.mxu0 %v1034_v3  ;;  %2142 = vmatprep.subr.mxu1 %v1068_v4 }
 0x1d9   :  { %2112 = vmatpush3.msra.mxu0 %v1018_v5  ;;  %2143 = vmatpush3.msra.mxu1 %v1052_v53 }
 0x1da   :  { %2113 = vmatprep.subr.mxu0 %v1033_v6  ;;  %2144 = vmatprep.subr.mxu1 %v1067_v7 }
 0x1db   :  { %2114 = vmatpush3.msra.mxu0 %v1017_v13  ;;  %2145 = vmatpush3.msra.mxu1 %v1051_v21 }
 0x1dc   :  { %2115 = vmatprep.subr.mxu0 %v1032_v14  ;;  %2146 = vmatprep.subr.mxu1 %v1066_v31 }
 0x1dd   :  { %2116 = vmatpush3.msra.mxu0 %v1016_v8  ;;  %2147 = vmatpush3.msra.mxu1 %v1050_v15  ;;  %v1744_v15 = vld [vmem:[%s2633_s7 + $0x10] sm:$0xff] }
 0x1de   :  { %1572 = vmatmul.mubr.f32.vlgmr.msra.gmra.mxu0 %v820_v17  ;;  %2148 = vmatprep.subr.mxu1 %v1065_v16  ;;  %v1743_v16 = vld [vmem:[%s2633_s7 + $0x8] sm:$0xff]  ;;  %v1742_v17 = vld [vmem:[%s2633_s7] sm:$0xff]  ;;  %s2271_s7 = scalar_lea.vmem %s1839_s18, 32 }
 0x1df   :  { %2149 = vmatpush3.msra.mxu1 %v1049_v34  ;;  %2181 = vmatprep.subr.mxu0 %v2298_v10  ;;  %p2272_p5 = scmp.ne.s32.totalorder %s1839_s18, %s2271_s7  ;;  %p2277_p7 = scmp.lt.s32.totalorder %s2271_s7, %s2271_s7 }
 0x1e0   :  { %2150 = vmatprep.subr.mxu1 %v1064_v41  ;;  %2182 = vmatpush3.msra.mxu0 %v1663_v48  ;;  %v1873_v48 = vld [vmem:[%s2634_s8] ss:$0 sm:$0xff] }
 0x1e1   :  { %2151 = vmatpush3.msra.mxu1 %v1048_v18  ;;  %2183 = vmatprep.subr.mxu0 %v2298_v10  ;;  %p2278_p8 = por %p2277_p7, %p2276_p6 }
 0x1e2   :  { %1642 = vmatmul.mubr.f32.vlgmr.msra.gmra.mxu1 %v822_v19  ;;  %2216 = vmatprep.subr.mxu1 %v2298_v10 }
 0x1e3   :  { %2184 = vmatpush3.msra.mxu0 %v1662_v58  ;;  %2213 = vmatprep.mubr.msk.f32.mxu0 %vm2299_vm4, %v2298_v10  ;;  %p2279_p9 = pnand %p2278_p8, %p2272_p5 }
 0x1e4   :  { %2185 = vmatprep.subr.mxu0 %v2298_v10  ;;  %2232 = vmatprep.mubr.msk.f32.mxu1 %vm2299_vm4, %v2298_v10 }
 0x1e5   :  { %2186 = vmatpush3.msra.mxu0 %v1661_v20  ;;  %2217 = vmatpush3.msra.mxu1 %v1749_v38 }
 0x1e6   :  { %2187 = vmatprep.subr.mxu0 %v2298_v10  ;;  %2218 = vmatprep.subr.mxu1 %v2298_v10 }
 0x1e7   :  { %2188 = vmatpush3.msra.mxu0 %v1660_v22  ;;  %2219 = vmatpush3.msra.mxu1 %v1748_v9 }
 0x1e8   :  { %2189 = vmatprep.subr.mxu0 %v2298_v10  ;;  %2220 = vmatprep.subr.mxu1 %v2298_v10 }
 0x1e9   :  { %2190 = vmatpush3.msra.mxu0 %v1659_v24  ;;  %2221 = vmatpush3.msra.mxu1 %v1747_v39 }
 0x1ea   :  { %2191 = vmatprep.subr.mxu0 %v2298_v10  ;;  %2222 = vmatprep.subr.mxu1 %v2298_v10 }
 0x1eb   :  { %2192 = vmatpush3.msra.mxu0 %v1658_v25  ;;  %2223 = vmatpush3.msra.mxu1 %v1746_v40 }
 0x1ec   :  { %2193 = vmatprep.subr.mxu0 %v2298_v10  ;;  %2224 = vmatprep.subr.mxu1 %v2298_v10 }
 0x1ed   :  { %2194 = vmatpush3.msra.mxu0 %v1657_v30  ;;  %2225 = vmatpush3.msra.mxu1 %v1745_v47 }
 0x1ee   :  { %2195 = vmatprep.subr.mxu0 %v2298_v10  ;;  %2226 = vmatprep.subr.mxu1 %v2298_v10 }
 0x1ef   :  { %2196 = vmatpush3.msra.mxu0 %v1656_v26  ;;  %2227 = vmatpush3.msra.mxu1 %v1744_v15 }
 0x1f0   :  { %2197 = vmatprep.subr.mxu0 %v2298_v10  ;;  %2228 = vmatprep.subr.mxu1 %v2298_v10 }
 0x1f1   :  { %2198 = vmatpush3.msra.mxu0 %v1655_v27  ;;  %2229 = vmatpush3.msra.mxu1 %v1743_v16 }
 0x1f2   :  { %2199 = vmatprep.subr.mxu0 %v2298_v10  ;;  %2230 = vmatprep.subr.mxu1 %v2298_v10 }
 0x1f3   :  { %2200 = vmatpush3.msra.mxu0 %v1654_v29  ;;  %2231 = vmatpush3.msra.mxu1 %v1742_v17 }
 0x1f4   :  { %2201 = vmatprep.subr.mxu0 %v2298_v10 }
 0x1f5   :  { %2202 = vmatpush3.msra.mxu0 %v1653_v32 }
 0x1f6   :  { %2203 = vmatprep.subr.mxu0 %v2298_v10 }
 0x1f7   :  { %2204 = vmatpush3.msra.mxu0 %v1652_v51 }
 0x1f8   :  { %2205 = vmatprep.subr.mxu0 %v2298_v10 }
 0x1f9   :  { %2206 = vmatpush3.msra.mxu0 %v1651_v33 }
 0x1fa   :  { %2207 = vmatprep.subr.mxu0 %v2298_v10 }
 0x1fb   :  { %2208 = vmatpush3.msra.mxu0 %v1650_v35 }
 0x1fc   :  { %2209 = vmatprep.subr.mxu0 %v2298_v10 }
 0x1fd   :  { %2210 = vmatpush3.msra.mxu0 %v1649_v36 }
 0x1fe   :  { %2211 = vmatprep.subr.mxu0 %v2298_v10 }
 0x1ff   :  { %2212 = vmatpush3.msra.mxu0 %v1648_v37 }
 0x239   :  { %v1907_v50 = vpop.f32.mrf.mxu0 }
 0x23b   :  { %v1908_v43 = vpop.f32.mrf.mxu0 }
 0x23c   :  { %v1909_v52 = vadd.f32 %v1908_v43, %v1907_v50 }
 0x23d   :  { %v1942_v42 = vpop.f32.mrf.mxu1 }
 0x23e   :  { %v1154_v59 = vadd.f32 %v1909_v52, %v1871_v54 }
 0x23f   :  { %v1943_v44 = vpop.f32.mrf.mxu1 }
 0x240   :  { %v1944_v57 = vadd.f32 %v1943_v44, %v1942_v42 }
 0x242   :  { %v1224_v61 = vadd.f32 %v1944_v57, %v1154_v59 }
 0x25a   :  { %v1977_v45 = vpop.f32.mrf.mxu0 }
 0x25c   :  { %v1978_v55 = vpop.f32.mrf.mxu0 }
 0x25d   :  { %v1979_v60 = vadd.f32 %v1978_v55, %v1977_v45 }
 0x25f   :  { %v2012_v46 = vpop.f32.mrf.mxu1  ;;  %v1294_v1 = vadd.f32 %v1979_v60, %v1224_v61 }
 0x261   :  { %v2013_v56 = vpop.f32.mrf.mxu1 }
 0x262   :  { %v2014_v62 = vadd.f32 %v2013_v56, %v2012_v46 }
 0x264   :  { %v1364_v3 = vadd.f32 %v2014_v62, %v1294_v1 }
 0x27c   :  { %v2047_v49 = vpop.f32.mrf.mxu0 }
 0x27e   :  { %v2048_v0 = vpop.f32.mrf.mxu0 }
 0x27f   :  { %v2049_v2 = vadd.f32 %v2048_v0, %v2047_v49 }
 0x281   :  { %v2082_v23 = vpop.f32.mrf.mxu1  ;;  %v1434_v53 = vadd.f32 %v2049_v2, %v1364_v3 }
 0x283   :  { %v2083_v63 = vpop.f32.mrf.mxu1 }
 0x284   :  { %v2084_v4 = vadd.f32 %v2083_v63, %v2082_v23 }
 0x286   :  { %v1504_v11 = vadd.f32 %v2084_v4, %v1434_v53 }
 0x29e   :  { %v2117_v12 = vpop.f32.mrf.mxu0 }
 0x2a0   :  { %v2118_v5 = vpop.f32.mrf.mxu0 }
 0x2a1   :  { %v2119_v6 = vadd.f32 %v2118_v5, %v2117_v12 }
 0x2a2   :  { %v2152_v7 = vpop.f32.mrf.mxu1 }
 0x2a3   :  { %v1574_v21 = vadd.f32 %v2119_v6, %v1504_v11 }
 0x2a4   :  { %v2153_v13 = vpop.f32.mrf.mxu1 }
 0x2a5   :  { %v2154_v14 = vadd.f32 %v2153_v13, %v2152_v7 }
 0x2a7   :  { %v1644_v31 = vadd.f32 %v2154_v14, %v1574_v21 }
 0x2a9   :  { %v1647_v8 = vmax.f32 %v1644_v31, 0.0 }
 0x2ab   :  { %2214 = vmatmul.mubr.f32.vlgmr.msra.gmra.mxu0 %v1647_v8 }
 0x36b   :  { %v1737_v34 = vpop.f32.mrf.mxu0 }
 0x36c   :  { %v1738_v41 = vadd.f32 %v1872_v28, %v1737_v34 }
 0x36d   :  { %v2215_v18 = vpop.f32.mrf.mxu0 }
 0x36e   :  { %v1741_v19 = vmax.f32 %v1738_v41, 0.0 }
 0x370   :  { %2233 = vmatmul.mubr.msk.f32.vlgmr.msra.gmra.mxu1 %vm1757_vm5, %v1741_v19 }
 0x430   :  { %v1827_v10 = vpop.f32.mrf.mxu1 }
 0x431   :  { %v1828_v58 = vadd.f32 %v1873_v48, %v1827_v10 }
 0x432   :  { %v2234_v20 = vpop.f32.mrf.mxu1 }
 0x433   :  { %1831 = vst [vmem:[#allocation6] sm:$0x3] %v1828_v58 }
 0x434   :  { %2282 = shalt.err (!%p2279_p9)
}
 0x435   :  { %1841 = dma.vmem_to_hbm [thread:$0]  %s1839_s18, 32, %s2635_s9, [#allocation5]  }
 0x436   :  { %2293 = dma.done.wait [#allocation5], 32  }
 0x437   :  { %2294 = vsyncadd [#allocation5], 4294967264 }
 0x438   :  { %1845 = vsyncpa [#allocation4], 1 }
 0x439   :  { %1846 = vsyncpa [#allocation5], 1 }

</bundles_post_ra>
